<compile_context>
chip_gen: v7x
topology: tpu7x:2x2x1
jax: 0.10.0
libtpu: 0.0.40
codegen_flags: <defaults>
</compile_context>

<pallas_src>
import math

import jax
import jax.numpy as jnp
from jax.experimental import pallas as pl
from jax.experimental.pallas import tpu as pltpu


# ----------------------------------------------------------------------------
# One-time cached feature probe: is pipeline_mode=pl.Buffered(1) supported?
# (isolated tiny compile so failures of the *real* kernel are never masked)
# ----------------------------------------------------------------------------
_BUFFERED_OK = None


def _buffered_weights_supported():
    global _BUFFERED_OK
    if _BUFFERED_OK is None:
        try:
            def _probe(x_ref, o_ref):
                o_ref[...] = x_ref[...]

            spec = pl.BlockSpec((8, 128), lambda i: (0, 0),
                                pipeline_mode=pl.Buffered(1))
            out = pl.pallas_call(
                _probe,
                out_shape=jax.ShapeDtypeStruct((8, 128), jnp.float32),
                grid=(1,),
                in_specs=[spec],
                out_specs=pl.BlockSpec((8, 128), lambda i: (0, 0)),
            )(jnp.zeros((8, 128), jnp.float32))
            jax.block_until_ready(out)
            _BUFFERED_OK = True
        except Exception:
            _BUFFERED_OK = False
    return _BUFFERED_OK


def _layer_norm(x, gamma, beta, eps=1e-5):
    """Single-pass LayerNorm: one traversal for E[x] and E[x^2]."""
    mean = jnp.mean(x, axis=-1, keepdims=True)
    mean_sq = jnp.mean(x * x, axis=-1, keepdims=True)
    var = mean_sq - mean * mean
    return (x - mean) * jax.lax.rsqrt(var + eps) * gamma + beta


def _make_kernel(num_heads, tq):
    def kernel(x_ref,
               wqkv_ref, bqkv_ref,
               wo_ref, bo_ref,
               g1_ref, b1_ref,
               wf_ref, bf_ref,
               g2_ref, b2_ref,
               y_ref,
               qh_scr, kh_scr, vh_scr):
        qi = pl.program_id(1)
        S, E = x_ref.shape[1], x_ref.shape[2]
        H = num_heads
        dh = E // H

        # ---- Fused QKV projection: once per batch element (first q-tile) ---
        @pl.when(qi == 0)
        def _():
            xb = x_ref[0].astype(jnp.bfloat16)                    # (S, E)
            qkv = (jnp.dot(xb, wqkv_ref[...],
                           preferred_element_type=jnp.float32)
                   + bqkv_ref[...]).astype(jnp.bfloat16)          # (S, 3E)

            def to_heads(t):                                      # (S,E)->(H,S,dh)
                return t.reshape(S, H, dh).transpose(1, 0, 2)

            qh_scr[...] = to_heads(qkv[:, :E])        # Wq/bq pre-scaled by 1/sqrt(dh)
            kh_scr[...] = to_heads(qkv[:, E:2 * E])
            vh_scr[...] = to_heads(qkv[:, 2 * E:])

        # ---- Attention for this query tile (heads batched on leading axis) -
        q0 = pl.multiple_of(qi * tq, tq)
        qh = qh_scr[:, pl.ds(q0, tq), :]                          # (H, tq, dh)
        s = jnp.einsum('hqd,hkd->hqk', qh, kh_scr[...],
                       preferred_element_type=jnp.float32)        # (H, tq, S)
        s = s - jnp.max(s, axis=-1, keepdims=True)
        p = jnp.exp(s)
        p = p * pl.reciprocal(jnp.sum(p, axis=-1, keepdims=True), approx=True)
        o = jnp.einsum('hqk,hkd->hqd', p.astype(jnp.bfloat16), vh_scr[...],
                       preferred_element_type=jnp.float32)        # (H, tq, dh)

        attn = jnp.transpose(o, (1, 0, 2)).reshape(tq, E)         # merge heads
        attn_out = (jnp.dot(attn.astype(jnp.bfloat16), wo_ref[...],
                            preferred_element_type=jnp.float32) + bo_ref[...])

        # ---- AddNorm1 + Linear + AddNorm2 (per-token, safe per q-tile) -----
        x_t = x_ref[0, pl.ds(q0, tq), :]                          # residual rows, f32
        y1 = _layer_norm(x_t + attn_out, g1_ref[...], b1_ref[...])
        y2 = (jnp.dot(y1.astype(jnp.bfloat16), wf_ref[...],
                      preferred_element_type=jnp.float32) + bf_ref[...])
        y3 = _layer_norm(y1 + y2, g2_ref[...], b2_ref[...])

        y_ref[0] = y3.astype(y_ref.dtype)

    return kernel


def _choose_q_tile(S):
    if S <= 256:
        return S
    for tq in (256, 128, 64, 32, 16, 8):
        if S % tq == 0:
            return tq
    return S


def _vmem_limit_bytes(S, E, H, tq, buffered_weights):
    """Per-generation scoped-VMEM budget from an honest residency estimate."""
    try:
        physical = int(getattr(pltpu.get_tpu_info(), "vmem_capacity_bytes",
                               64 * 1024 * 1024))
    except Exception:
        physical = 64 * 1024 * 1024                 # conservative (v7x-sized)
    budget = physical * 3 // 4                      # headroom for compiler scratch

    lane = lambda n: max(n, 128)
    dh = E // H
    wbuf = 1 if buffered_weights else 2
    weights = wbuf * (E * lane(3 * E) + 2 * E * lane(E)) * 2        # bf16 matrices
    vectors = wbuf * (7 * lane(E) + lane(3 * E)) * 4                # f32 row vectors
    acts = 2 * S * lane(E) * 4 + 2 * tq * lane(E) * 4               # x in / y out (dbl buf)
    scratch = 3 * H * S * lane(dh) * 2                              # qh/kh/vh bf16
    temps = (S * lane(3 * E) + H * tq * lane(S) + 8 * tq * lane(E)) * 4
    needed = weights + vectors + acts + scratch + temps
    return int(min(budget, max(needed * 3 // 2, 32 * 1024 * 1024)))


def _pallas_forward(x, kernel_args, num_heads):
    B, S, E = x.shape
    H = num_heads
    dh = E // H
    tq = _choose_q_tile(S)
    nq = S // tq

    buffered = _buffered_weights_supported()
    w_kw = {"pipeline_mode": pl.Buffered(1)} if buffered else {}

    x_spec = pl.BlockSpec((1, S, E), lambda b, q: (b, 0, 0))
    out_spec = pl.BlockSpec((1, tq, E), lambda b, q: (b, q, 0))
    mat3_spec = pl.BlockSpec((E, 3 * E), lambda b, q: (0, 0), **w_kw)
    mat_spec = pl.BlockSpec((E, E), lambda b, q: (0, 0), **w_kw)
    vec3_spec = pl.BlockSpec((1, 3 * E), lambda b, q: (0, 0), **w_kw)
    vec_spec = pl.BlockSpec((1, E), lambda b, q: (0, 0), **w_kw)

    in_specs = [
        x_spec,
        mat3_spec, vec3_spec,      # fused Wqkv^T (Q third pre-scaled), bqkv
        mat_spec, vec_spec,        # Wo^T, bo
        vec_spec, vec_spec,        # ln1 gamma, beta
        mat_spec, vec_spec,        # Wf^T, bf
        vec_spec, vec_spec,        # ln2 gamma, beta
    ]

    scratch_shapes = [
        pltpu.VMEM((H, S, dh), jnp.bfloat16),   # Q in head layout (pre-scaled)
        pltpu.VMEM((H, S, dh), jnp.bfloat16),   # K in head layout
        pltpu.VMEM((H, S, dh), jnp.bfloat16),   # V in head layout
    ]

    return pl.pallas_call(
        _make_kernel(num_heads, tq),
        out_shape=jax.ShapeDtypeStruct((B, S, E), x.dtype),
        grid=(B, nq),
        in_specs=in_specs,
        out_specs=out_spec,
        scratch_shapes=scratch_shapes,
        compiler_params=pltpu.CompilerParams(
            dimension_semantics=("parallel", "arbitrary"),
            vmem_limit_bytes=_vmem_limit_bytes(S, E, H, tq, buffered)),
    )(x, *kernel_args)


def prepare_params(params, num_heads):
    """Host-side weight prep, done ONCE (not per forward call):
    transpose weights, fuse Q/K/V into (E, 3E) with 1/sqrt(dh) folded into
    the Q third, and cast matmul weights to bf16."""
    E = params["wq"].shape[0]
    dh = E // num_heads
    scale = 1.0 / math.sqrt(dh)
    bf16, f32 = jnp.bfloat16, jnp.float32

    wqkv = jnp.concatenate(
        [params["wq"].T * scale, params["wk"].T, params["wv"].T],
        axis=1).astype(bf16)                                       # (E, 3E)
    bqkv = jnp.concatenate(
        [params["bq"] * scale, params["bk"], params["bv"]],
        axis=1).astype(f32)                                        # (1, 3E)

    return (
        wqkv, bqkv,
        params["wo"].T.astype(bf16), params["bo"].astype(f32),
        params["g1"].astype(f32), params["b1"].astype(f32),
        params["wf"].T.astype(bf16), params["bf"].astype(f32),
        params["g2"].astype(f32), params["b2"].astype(f32),
    )


def bert_block_pallas(x, prepared_params, num_heads):
    """x: (B, S, E) float32; prepared_params: output of prepare_params()."""
    return _pallas_forward(x, prepared_params, num_heads)


def bert_block_ref(x, params, num_heads):
    """Pure-JAX f32 reference matching the PyTorch forward (eval mode)."""
    B, S, E = x.shape
    dh = E // num_heads
    scale = 1.0 / math.sqrt(dh)

    q = x @ params["wq"].T + params["bq"]
    k = x @ params["wk"].T + params["bk"]
    v = x @ params["wv"].T + params["bv"]

    def split_heads(t):  # (B,S,E) -> (B,H,S,dh)
        return t.reshape(B, S, num_heads, dh).transpose(0, 2, 1, 3)

    qh, kh, vh = split_heads(q), split_heads(k), split_heads(v)
    s = jnp.einsum("bhqd,bhkd->bhqk", qh, kh) * scale
    p = jax.nn.softmax(s, axis=-1)
    a = jnp.einsum("bhqk,bhkd->bhqd", p, vh)
    a = a.transpose(0, 2, 1, 3).reshape(B, S, E)
    attn_out = a @ params["wo"].T + params["bo"]

    y1 = _layer_norm(x + attn_out, params["g1"], params["b1"])
    y2 = y1 @ params["wf"].T + params["bf"]
    y3 = _layer_norm(y1 + y2, params["g2"], params["b2"])
    return y3


def init_params(key, hidden):
    ks = jax.random.split(key, 5)
    scale = 0.02
    return {
        "wq": scale * jax.random.normal(ks[0], (hidden, hidden), jnp.float32),
        "wk": scale * jax.random.normal(ks[1], (hidden, hidden), jnp.float32),
        "wv": scale * jax.random.normal(ks[2], (hidden, hidden), jnp.float32),
        "wo": scale * jax.random.normal(ks[3], (hidden, hidden), jnp.float32),
        "wf": scale * jax.random.normal(ks[4], (hidden, hidden), jnp.float32),
        "bq": jnp.zeros((1, hidden), jnp.float32),
        "bk": jnp.zeros((1, hidden), jnp.float32),
        "bv": jnp.zeros((1, hidden), jnp.float32),
        "bo": jnp.zeros((1, hidden), jnp.float32),
        "bf": jnp.zeros((1, hidden), jnp.float32),
        "g1": jnp.ones((1, hidden), jnp.float32),
        "b1": jnp.zeros((1, hidden), jnp.float32),
        "g2": jnp.ones((1, hidden), jnp.float32),
        "b2": jnp.zeros((1, hidden), jnp.float32),
    }


if __name__ == "__main__":
    B, S, E, H = 2, 8, 32, 4   # batch, seq, hidden, num_heads
    key = jax.random.PRNGKey(0)
    kx, kp = jax.random.split(key)
    x = jax.random.normal(kx, (B, S, E), jnp.float32)
    params = init_params(kp, E)

    prepped = prepare_params(params, H)          # one-time host-side prep
    out = bert_block_pallas(x, prepped, H)
    out = jax.block_until_ready(out)

    ref = bert_block_ref(x, params, H)
    assert out.shape == (B, S, E)
    # bf16 matmul inputs (f32 accumulation) -> slightly loosened tolerance.
    assert jnp.allclose(out, ref, atol=2e-2, rtol=2e-2), "mismatch vs JAX reference"

    print("KERNEL_OK")
</pallas_src>

<mosaic_0001>
module attributes {stable_mosaic.version = 11 : i64} {
  func.func @_probe(%arg0: i32, %arg1: memref<8x128xf32, #tpu.memory_space<vmem>>, %arg2: memref<8x128xf32, #tpu.memory_space<vmem>>) attributes {dimension_semantics = [#tpu.dimension_semantics<arbitrary>], iteration_bounds = array<i64: 1>, scalar_prefetch = 0 : i64, scratch_operands = 0 : i64, tpu.core_type = #tpu.core_type<tc>, window_params = [{pipeline_mode = #tpu.pipeline_mode<synchronous>, transform_indices = @transform_0, window_bounds = array<i64: 8, 128>}, {pipeline_mode = #tpu.pipeline_mode<synchronous>, transform_indices = @transform_1, window_bounds = array<i64: 8, 128>}]} {
    %c0 = arith.constant 0 : index
    %c0_0 = arith.constant 0 : index
    %0 = vector.load %arg1[%c0, %c0_0] : memref<8x128xf32, #tpu.memory_space<vmem>>, vector<8x128xf32>
    %c0_1 = arith.constant 0 : index
    %c0_2 = arith.constant 0 : index
    %1 = vector.load %arg2[%c0_1, %c0_2] : memref<8x128xf32, #tpu.memory_space<vmem>>, vector<8x128xf32>
    tpu.vector_store %arg2[%c0_1, %c0_2], %0 {strides = array<i32>} : memref<8x128xf32, #tpu.memory_space<vmem>>, vector<8x128xf32>,
    return
  }
  func.func @transform_0(%arg0: i32) -> (i32, i32) {
    %c0_i32 = arith.constant 0 : i32
    %c0_i32_0 = arith.constant 0 : i32
    %c0_i32_1 = arith.constant 0 : i32
    return %c0_i32, %c0_i32_0 : i32, i32
  }
  func.func @transform_1(%arg0: i32) -> (i32, i32) {
    %c0_i32 = arith.constant 0 : i32
    %c0_i32_0 = arith.constant 0 : i32
    %c0_i32_1 = arith.constant 0 : i32
    return %c0_i32, %c0_i32_0 : i32, i32
  }
}

module attributes {stable_mosaic.version = 11 : i64} {
  func.func @kernel(%arg0: i32, %arg1: i32, %arg2: memref<1x8x32xf32, #tpu.memory_space<vmem>>, %arg3: memref<32x96xbf16, #tpu.memory_space<vmem>>, %arg4: memref<1x96xf32, #tpu.memory_space<vmem>>, %arg5: memref<32x32xbf16, #tpu.memory_space<vmem>>, %arg6: memref<1x32xf32, #tpu.memory_space<vmem>>, %arg7: memref<1x32xf32, #tpu.memory_space<vmem>>, %arg8: memref<1x32xf32, #tpu.memory_space<vmem>>, %arg9: memref<32x32xbf16, #tpu.memory_space<vmem>>, %arg10: memref<1x32xf32, #tpu.memory_space<vmem>>, %arg11: memref<1x32xf32, #tpu.memory_space<vmem>>, %arg12: memref<1x32xf32, #tpu.memory_space<vmem>>, %arg13: memref<1x8x32xf32, #tpu.memory_space<vmem>>, %arg14: memref<4x8x8xbf16, #tpu.memory_space<vmem>>, %arg15: memref<4x8x8xbf16, #tpu.memory_space<vmem>>, %arg16: memref<4x8x8xbf16, #tpu.memory_space<vmem>>) attributes {dimension_semantics = [#tpu.dimension_semantics<parallel>, #tpu.dimension_semantics<arbitrary>], iteration_bounds = array<i64: 2, 1>, scalar_prefetch = 0 : i64, scratch_operands = 3 : i64, tpu.core_type = #tpu.core_type<tc>, window_params = [{transform_indices = @transform_0, window_bounds = array<i64: 1, 8, 32>}, {pipeline_mode = #tpu.pipeline_mode<synchronous>, transform_indices = @transform_1, window_bounds = array<i64: 32, 96>}, {pipeline_mode = #tpu.pipeline_mode<synchronous>, transform_indices = @transform_2, window_bounds = array<i64: 1, 96>}, {pipeline_mode = #tpu.pipeline_mode<synchronous>, transform_indices = @transform_3, window_bounds = array<i64: 32, 32>}, {pipeline_mode = #tpu.pipeline_mode<synchronous>, transform_indices = @transform_4, window_bounds = array<i64: 1, 32>}, {pipeline_mode = #tpu.pipeline_mode<synchronous>, transform_indices = @transform_5, window_bounds = array<i64: 1, 32>}, {pipeline_mode = #tpu.pipeline_mode<synchronous>, transform_indices = @transform_6, window_bounds = array<i64: 1, 32>}, {pipeline_mode = #tpu.pipeline_mode<synchronous>, transform_indices = @transform_7, window_bounds = array<i64: 32, 32>}, {pipeline_mode = #tpu.pipeline_mode<synchronous>, transform_indices = @transform_8, window_bounds = array<i64: 1, 32>}, {pipeline_mode = #tpu.pipeline_mode<synchronous>, transform_indices = @transform_9, window_bounds = array<i64: 1, 32>}, {pipeline_mode = #tpu.pipeline_mode<synchronous>, transform_indices = @transform_10, window_bounds = array<i64: 1, 32>}, {transform_indices = @transform_11, window_bounds = array<i64: 1, 8, 32>}]} {
    %c0_i32 = arith.constant 0 : i32
    %0 = arith.cmpi eq, %arg1, %c0_i32 : i32
    %1 = arith.extui %0 : i1 to i32
    %c0_i32_0 = arith.constant 0 : i32
    %2 = arith.cmpi ne, %1, %c0_i32_0 : i32
    scf.if %2 {
      %c0_44 = arith.constant 0 : index
      %c0_45 = arith.constant 0 : index
      %c0_46 = arith.constant 0 : index
      %92 = vector.load %arg2[%c0_44, %c0_45, %c0_46] : memref<1x8x32xf32, #tpu.memory_space<vmem>>, vector<1x8x32xf32>
      %93 = vector.shape_cast %92 : vector<1x8x32xf32> to vector<8x32xf32>
      %94 = arith.truncf %93 : vector<8x32xf32> to vector<8x32xbf16>
      %c0_47 = arith.constant 0 : index
      %c0_48 = arith.constant 0 : index
      %95 = vector.load %arg3[%c0_47, %c0_48] : memref<32x96xbf16, #tpu.memory_space<vmem>>, vector<32x96xbf16>
      %cst_49 = arith.constant dense<0.000000e+00> : vector<8x96xf32>
      %96 = tpu.matmul %94, %95, %cst_49 {dimension_numbers = #tpu.dot_dimension_numbers<[1], [0], [0], [1], [0, 0, 1, 1], [], []>} : vector<8x32xbf16>, vector<32x96xbf16>, vector<8x96xf32> -> vector<8x96xf32>
      %c0_50 = arith.constant 0 : index
      %c0_51 = arith.constant 0 : index
      %97 = vector.load %arg4[%c0_50, %c0_51] : memref<1x96xf32, #tpu.memory_space<vmem>>, vector<1x96xf32>
      %98 = vector.broadcast %97 : vector<1x96xf32> to vector<8x96xf32>
      %99 = arith.addf %96, %98 : vector<8x96xf32>
      %100 = arith.truncf %99 : vector<8x96xf32> to vector<8x96xbf16>
      %101 = vector.extract_strided_slice %100 {offsets = [0, 0], sizes = [8, 32], strides = [1, 1]} : vector<8x96xbf16> to vector<8x32xbf16>
      %102 = vector.shape_cast %101 : vector<8x32xbf16> to vector<8x4x8xbf16>
      %103 = tpu.transpose %102, [1, 0, 2] : vector<8x4x8xbf16> -> vector<4x8x8xbf16>
      %c0_52 = arith.constant 0 : index
      %c0_53 = arith.constant 0 : index
      %c0_54 = arith.constant 0 : index
      %104 = vector.load %arg14[%c0_52, %c0_53, %c0_54] : memref<4x8x8xbf16, #tpu.memory_space<vmem>>, vector<4x8x8xbf16>
      tpu.vector_store %arg14[%c0_52, %c0_53, %c0_54], %103 {strides = array<i32>} : memref<4x8x8xbf16, #tpu.memory_space<vmem>>, vector<4x8x8xbf16>,
      %105 = vector.extract_strided_slice %100 {offsets = [0, 32], sizes = [8, 32], strides = [1, 1]} : vector<8x96xbf16> to vector<8x32xbf16>
      %106 = vector.shape_cast %105 : vector<8x32xbf16> to vector<8x4x8xbf16>
      %107 = tpu.transpose %106, [1, 0, 2] : vector<8x4x8xbf16> -> vector<4x8x8xbf16>
      %c0_55 = arith.constant 0 : index
      %c0_56 = arith.constant 0 : index
      %c0_57 = arith.constant 0 : index
      %108 = vector.load %arg15[%c0_55, %c0_56, %c0_57] : memref<4x8x8xbf16, #tpu.memory_space<vmem>>, vector<4x8x8xbf16>
      tpu.vector_store %arg15[%c0_55, %c0_56, %c0_57], %107 {strides = array<i32>} : memref<4x8x8xbf16, #tpu.memory_space<vmem>>, vector<4x8x8xbf16>,
      %109 = vector.extract_strided_slice %100 {offsets = [0, 64], sizes = [8, 32], strides = [1, 1]} : vector<8x96xbf16> to vector<8x32xbf16>
      %110 = vector.shape_cast %109 : vector<8x32xbf16> to vector<8x4x8xbf16>
      %111 = tpu.transpose %110, [1, 0, 2] : vector<8x4x8xbf16> -> vector<4x8x8xbf16>
      %c0_58 = arith.constant 0 : index
      %c0_59 = arith.constant 0 : index
      %c0_60 = arith.constant 0 : index
      %112 = vector.load %arg16[%c0_58, %c0_59, %c0_60] : memref<4x8x8xbf16, #tpu.memory_space<vmem>>, vector<4x8x8xbf16>
      tpu.vector_store %arg16[%c0_58, %c0_59, %c0_60], %111 {strides = array<i32>} : memref<4x8x8xbf16, #tpu.memory_space<vmem>>, vector<4x8x8xbf16>,
    } else {
    }
    %c8_i32 = arith.constant 8 : i32
    %3 = arith.muli %arg1, %c8_i32 : i32
    %4 = tpu.assume_multiple %3, 8 : i32
    %c0 = arith.constant 0 : index
    %5 = arith.index_cast %4 : i32 to index
    %c0_1 = arith.constant 0 : index
    %6 = vector.load %arg14[%c0, %5, %c0_1] : memref<4x8x8xbf16, #tpu.memory_space<vmem>>, vector<4x8x8xbf16>
    %c0_2 = arith.constant 0 : index
    %c0_3 = arith.constant 0 : index
    %c0_4 = arith.constant 0 : index
    %7 = vector.load %arg15[%c0_2, %c0_3, %c0_4] : memref<4x8x8xbf16, #tpu.memory_space<vmem>>, vector<4x8x8xbf16>
    "tpu.trace_start"() <{level = 10 : i32, message = "hqd,hkd->hqk"}> : () -> ()
    %cst = arith.constant dense<0.000000e+00> : vector<4x8x8xf32>
    %8 = tpu.matmul %6, %7, %cst {dimension_numbers = #tpu.dot_dimension_numbers<[2], [2], [1], [1], [0, 0, 0, 1, 1, 1], [0], [0]>} : vector<4x8x8xbf16>, vector<4x8x8xbf16>, vector<4x8x8xf32> -> vector<4x8x8xf32>
    "tpu.trace_stop"() : () -> ()
    %cst_5 = arith.constant dense<0xFF800000> : vector<4x8xf32>
    %9 = vector.multi_reduction <maximumf>, %8, %cst_5 [2] : vector<4x8x8xf32> to vector<4x8xf32>
    %10 = vector.shape_cast %9 : vector<4x8xf32> to vector<4x8x1xf32>
    %11 = vector.broadcast %10 : vector<4x8x1xf32> to vector<4x8x8xf32>
    %12 = arith.subf %8, %11 : vector<4x8x8xf32>
    %13 = math.exp %12 : vector<4x8x8xf32>
    %cst_6 = arith.constant dense<0.000000e+00> : vector<4x8xf32>
    %14 = vector.multi_reduction <add>, %13, %cst_6 [2] : vector<4x8x8xf32> to vector<4x8xf32>
    %15 = vector.shape_cast %14 : vector<4x8xf32> to vector<4x8x1xf32>
    %16 = tpu.reciprocal %15 {approx = true} : vector<4x8x1xf32> -> vector<4x8x1xf32>
    %17 = vector.broadcast %16 : vector<4x8x1xf32> to vector<4x8x8xf32>
    %18 = arith.mulf %13, %17 : vector<4x8x8xf32>
    %19 = arith.truncf %18 : vector<4x8x8xf32> to vector<4x8x8xbf16>
    %c0_7 = arith.constant 0 : index
    %c0_8 = arith.constant 0 : index
    %c0_9 = arith.constant 0 : index
    %20 = vector.load %arg16[%c0_7, %c0_8, %c0_9] : memref<4x8x8xbf16, #tpu.memory_space<vmem>>, vector<4x8x8xbf16>
    "tpu.trace_start"() <{level = 10 : i32, message = "hqk,hkd->hqd"}> : () -> ()
    %cst_10 = arith.constant dense<0.000000e+00> : vector<4x8x8xf32>
    %21 = tpu.matmul %19, %20, %cst_10 {dimension_numbers = #tpu.dot_dimension_numbers<[2], [1], [1], [2], [0, 0, 0, 1, 1, 2], [0], [0]>} : vector<4x8x8xbf16>, vector<4x8x8xbf16>, vector<4x8x8xf32> -> vector<4x8x8xf32>
    "tpu.trace_stop"() : () -> ()
    %22 = tpu.transpose %21, [1, 0, 2] : vector<4x8x8xf32> -> vector<8x4x8xf32>
    %23 = vector.shape_cast %22 : vector<8x4x8xf32> to vector<8x32xf32>
    %24 = arith.truncf %23 : vector<8x32xf32> to vector<8x32xbf16>
    %c0_11 = arith.constant 0 : index
    %c0_12 = arith.constant 0 : index
    %25 = vector.load %arg5[%c0_11, %c0_12] : memref<32x32xbf16, #tpu.memory_space<vmem>>, vector<32x32xbf16>
    %cst_13 = arith.constant dense<0.000000e+00> : vector<8x32xf32>
    %26 = tpu.matmul %24, %25, %cst_13 {dimension_numbers = #tpu.dot_dimension_numbers<[1], [0], [0], [1], [0, 0, 1, 1], [], []>} : vector<8x32xbf16>, vector<32x32xbf16>, vector<8x32xf32> -> vector<8x32xf32>
    %c0_14 = arith.constant 0 : index
    %c0_15 = arith.constant 0 : index
    %27 = vector.load %arg6[%c0_14, %c0_15] : memref<1x32xf32, #tpu.memory_space<vmem>>, vector<1x32xf32>
    %28 = vector.broadcast %27 : vector<1x32xf32> to vector<8x32xf32>
    %29 = arith.addf %26, %28 : vector<8x32xf32>
    %c0_16 = arith.constant 0 : index
    %30 = arith.index_cast %4 : i32 to index
    %c0_17 = arith.constant 0 : index
    %31 = vector.load %arg2[%c0_16, %30, %c0_17] : memref<1x8x32xf32, #tpu.memory_space<vmem>>, vector<1x8x32xf32>
    %32 = vector.shape_cast %31 : vector<1x8x32xf32> to vector<8x32xf32>
    %33 = arith.addf %32, %29 : vector<8x32xf32>
    %c0_18 = arith.constant 0 : index
    %c0_19 = arith.constant 0 : index
    %34 = vector.load %arg7[%c0_18, %c0_19] : memref<1x32xf32, #tpu.memory_space<vmem>>, vector<1x32xf32>
    %c0_20 = arith.constant 0 : index
    %c0_21 = arith.constant 0 : index
    %35 = vector.load %arg8[%c0_20, %c0_21] : memref<1x32xf32, #tpu.memory_space<vmem>>, vector<1x32xf32>
    %cst_22 = arith.constant dense<0.000000e+00> : vector<8xf32>
    %36 = vector.multi_reduction <add>, %33, %cst_22 [1] : vector<8x32xf32> to vector<8xf32>
    %37 = vector.shape_cast %36 : vector<8xf32> to vector<8x1xf32>
    %cst_23 = arith.constant 3.200000e+01 : f32
    %38 = vector.broadcast %cst_23 : f32 to vector<8x1xf32>
    %39 = arith.divf %37, %38 : vector<8x1xf32>
    %40 = arith.mulf %33, %33 : vector<8x32xf32>
    %cst_24 = arith.constant dense<0.000000e+00> : vector<8xf32>
    %41 = vector.multi_reduction <add>, %40, %cst_24 [1] : vector<8x32xf32> to vector<8xf32>
    %42 = vector.shape_cast %41 : vector<8xf32> to vector<8x1xf32>
    %cst_25 = arith.constant 3.200000e+01 : f32
    %43 = vector.broadcast %cst_25 : f32 to vector<8x1xf32>
    %44 = arith.divf %42, %43 : vector<8x1xf32>
    %45 = arith.mulf %39, %39 : vector<8x1xf32>
    %46 = arith.subf %44, %45 : vector<8x1xf32>
    %47 = vector.broadcast %39 : vector<8x1xf32> to vector<8x32xf32>
    %48 = arith.subf %33, %47 : vector<8x32xf32>
    %cst_26 = arith.constant 9.99999974E-6 : f32
    %49 = vector.broadcast %cst_26 : f32 to vector<8x1xf32>
    %50 = arith.addf %46, %49 : vector<8x1xf32>
    %51 = math.rsqrt %50 : vector<8x1xf32>
    %52 = vector.broadcast %51 : vector<8x1xf32> to vector<8x32xf32>
    %53 = arith.mulf %48, %52 : vector<8x32xf32>
    %54 = vector.broadcast %34 : vector<1x32xf32> to vector<8x32xf32>
    %55 = arith.mulf %53, %54 : vector<8x32xf32>
    %56 = vector.broadcast %35 : vector<1x32xf32> to vector<8x32xf32>
    %57 = arith.addf %55, %56 : vector<8x32xf32>
    %58 = arith.truncf %57 : vector<8x32xf32> to vector<8x32xbf16>
    %c0_27 = arith.constant 0 : index
    %c0_28 = arith.constant 0 : index
    %59 = vector.load %arg9[%c0_27, %c0_28] : memref<32x32xbf16, #tpu.memory_space<vmem>>, vector<32x32xbf16>
    %cst_29 = arith.constant dense<0.000000e+00> : vector<8x32xf32>
    %60 = tpu.matmul %58, %59, %cst_29 {dimension_numbers = #tpu.dot_dimension_numbers<[1], [0], [0], [1], [0, 0, 1, 1], [], []>} : vector<8x32xbf16>, vector<32x32xbf16>, vector<8x32xf32> -> vector<8x32xf32>
    %c0_30 = arith.constant 0 : index
    %c0_31 = arith.constant 0 : index
    %61 = vector.load %arg10[%c0_30, %c0_31] : memref<1x32xf32, #tpu.memory_space<vmem>>, vector<1x32xf32>
    %62 = vector.broadcast %61 : vector<1x32xf32> to vector<8x32xf32>
    %63 = arith.addf %60, %62 : vector<8x32xf32>
    %64 = arith.addf %57, %63 : vector<8x32xf32>
    %c0_32 = arith.constant 0 : index
    %c0_33 = arith.constant 0 : index
    %65 = vector.load %arg11[%c0_32, %c0_33] : memref<1x32xf32, #tpu.memory_space<vmem>>, vector<1x32xf32>
    %c0_34 = arith.constant 0 : index
    %c0_35 = arith.constant 0 : index
    %66 = vector.load %arg12[%c0_34, %c0_35] : memref<1x32xf32, #tpu.memory_space<vmem>>, vector<1x32xf32>
    %cst_36 = arith.constant dense<0.000000e+00> : vector<8xf32>
    %67 = vector.multi_reduction <add>, %64, %cst_36 [1] : vector<8x32xf32> to vector<8xf32>
    %68 = vector.shape_cast %67 : vector<8xf32> to vector<8x1xf32>
    %cst_37 = arith.constant 3.200000e+01 : f32
    %69 = vector.broadcast %cst_37 : f32 to vector<8x1xf32>
    %70 = arith.divf %68, %69 : vector<8x1xf32>
    %71 = arith.mulf %64, %64 : vector<8x32xf32>
    %cst_38 = arith.constant dense<0.000000e+00> : vector<8xf32>
    %72 = vector.multi_reduction <add>, %71, %cst_38 [1] : vector<8x32xf32> to vector<8xf32>
    %73 = vector.shape_cast %72 : vector<8xf32> to vector<8x1xf32>
    %cst_39 = arith.constant 3.200000e+01 : f32
    %74 = vector.broadcast %cst_39 : f32 to vector<8x1xf32>
    %75 = arith.divf %73, %74 : vector<8x1xf32>
    %76 = arith.mulf %70, %70 : vector<8x1xf32>
    %77 = arith.subf %75, %76 : vector<8x1xf32>
    %78 = vector.broadcast %70 : vector<8x1xf32> to vector<8x32xf32>
    %79 = arith.subf %64, %78 : vector<8x32xf32>
    %cst_40 = arith.constant 9.99999974E-6 : f32
    %80 = vector.broadcast %cst_40 : f32 to vector<8x1xf32>
    %81 = arith.addf %77, %80 : vector<8x1xf32>
    %82 = math.rsqrt %81 : vector<8x1xf32>
    %83 = vector.broadcast %82 : vector<8x1xf32> to vector<8x32xf32>
    %84 = arith.mulf %79, %83 : vector<8x32xf32>
    %85 = vector.broadcast %65 : vector<1x32xf32> to vector<8x32xf32>
    %86 = arith.mulf %84, %85 : vector<8x32xf32>
    %87 = vector.broadcast %66 : vector<1x32xf32> to vector<8x32xf32>
    %88 = arith.addf %86, %87 : vector<8x32xf32>
    %c0_41 = arith.constant 0 : index
    %c0_42 = arith.constant 0 : index
    %c0_43 = arith.constant 0 : index
    %89 = vector.load %arg13[%c0_41, %c0_42, %c0_43] : memref<1x8x32xf32, #tpu.memory_space<vmem>>, vector<1x8x32xf32>
    %90 = vector.shape_cast %89 : vector<1x8x32xf32> to vector<8x32xf32>
    %91 = vector.shape_cast %88 : vector<8x32xf32> to vector<1x8x32xf32>
    tpu.vector_store %arg13[%c0_41, %c0_42, %c0_43], %91 {strides = array<i32>} : memref<1x8x32xf32, #tpu.memory_space<vmem>>, vector<1x8x32xf32>,
    return
  }
  func.func @transform_0(%arg0: i32, %arg1: i32) -> (i32, i32, i32) {
    %c0_i32 = arith.constant 0 : i32
    %c0_i32_0 = arith.constant 0 : i32
    %c0_i32_1 = arith.constant 0 : i32
    return %arg0, %c0_i32, %c0_i32_0 : i32, i32, i32
  }
  func.func @transform_1(%arg0: i32, %arg1: i32) -> (i32, i32) {
    %c0_i32 = arith.constant 0 : i32
    %c0_i32_0 = arith.constant 0 : i32
    %c0_i32_1 = arith.constant 0 : i32
    return %c0_i32, %c0_i32_0 : i32, i32
  }
  func.func @transform_2(%arg0: i32, %arg1: i32) -> (i32, i32) {
    %c0_i32 = arith.constant 0 : i32
    %c0_i32_0 = arith.constant 0 : i32
    %c0_i32_1 = arith.constant 0 : i32
    return %c0_i32, %c0_i32_0 : i32, i32
  }
  func.func @transform_3(%arg0: i32, %arg1: i32) -> (i32, i32) {
    %c0_i32 = arith.constant 0 : i32
    %c0_i32_0 = arith.constant 0 : i32
    %c0_i32_1 = arith.constant 0 : i32
    return %c0_i32, %c0_i32_0 : i32, i32
  }
  func.func @transform_4(%arg0: i32, %arg1: i32) -> (i32, i32) {
    %c0_i32 = arith.constant 0 : i32
    %c0_i32_0 = arith.constant 0 : i32
    %c0_i32_1 = arith.constant 0 : i32
    return %c0_i32, %c0_i32_0 : i32, i32
  }
  func.func @transform_5(%arg0: i32, %arg1: i32) -> (i32, i32) {
    %c0_i32 = arith.constant 0 : i32
    %c0_i32_0 = arith.constant 0 : i32
    %c0_i32_1 = arith.constant 0 : i32
    return %c0_i32, %c0_i32_0 : i32, i32
  }
  func.func @transform_6(%arg0: i32, %arg1: i32) -> (i32, i32) {
    %c0_i32 = arith.constant 0 : i32
    %c0_i32_0 = arith.constant 0 : i32
    %c0_i32_1 = arith.constant 0 : i32
    return %c0_i32, %c0_i32_0 : i32, i32
  }
  func.func @transform_7(%arg0: i32, %arg1: i32) -> (i32, i32) {
    %c0_i32 = arith.constant 0 : i32
    %c0_i32_0 = arith.constant 0 : i32
    %c0_i32_1 = arith.constant 0 : i32
    return %c0_i32, %c0_i32_0 : i32, i32
  }
  func.func @transform_8(%arg0: i32, %arg1: i32) -> (i32, i32) {
    %c0_i32 = arith.constant 0 : i32
    %c0_i32_0 = arith.constant 0 : i32
    %c0_i32_1 = arith.constant 0 : i32
    return %c0_i32, %c0_i32_0 : i32, i32
  }
  func.func @transform_9(%arg0: i32, %arg1: i32) -> (i32, i32) {
    %c0_i32 = arith.constant 0 : i32
    %c0_i32_0 = arith.constant 0 : i32
    %c0_i32_1 = arith.constant 0 : i32
    return %c0_i32, %c0_i32_0 : i32, i32
  }
  func.func @transform_10(%arg0: i32, %arg1: i32) -> (i32, i32) {
    %c0_i32 = arith.constant 0 : i32
    %c0_i32_0 = arith.constant 0 : i32
    %c0_i32_1 = arith.constant 0 : i32
    return %c0_i32, %c0_i32_0 : i32, i32
  }
  func.func @transform_11(%arg0: i32, %arg1: i32) -> (i32, i32, i32) {
    %c0_i32 = arith.constant 0 : i32
    %c0_i32_0 = arith.constant 0 : i32
    return %arg0, %arg1, %c0_i32 : i32, i32, i32
  }
}

</mosaic_0001>

<bundles_post_ra>
// kernel: tpu_custom_call.1
= control target key start
LH: loop header
LB: loop body
LE: loop exit
PB: predicated region body
PF: predicated region fallthrough
CT: control target
= control target key end

     0   :  { %6 = vsyncpa [#allocation3], 0  ;;  %s124_s0 = inlined_call_operand.hbm [shape: f32[8,128], index: 0, kind: input, shape index: {}]   ;;  %s125_s1 = inlined_call_operand.hbm [shape: f32[8,128], index: 1, kind: output, shape index: {}]  }
   0x1   :  { %7 = vsyncpa [#allocation4], 0  ;;  %s88_s6 = smov [#allocation2]   ;;  %s40_s10 = scalar_lea.hbm %s124_s0, 128 }
   0x2   :  { %s14_s7 = sshll.u32 %s88_s6, 4  ;;  %p41_p0 = scmp.ne.s32.totalorder %s124_s0, %s40_s10  ;;  %s15_s7 = int_to_ptr.vmem [resolvable:$true] %s14_s7 }
   0x3   :  { %p44_p1 = scmp.lt.u32.totalorder %s40_s10, %s124_s0 }
   0x5   :  { %p46_p2 = pnand %p44_p1, %p41_p0 }
   0x7   :  { %49 = shalt.err (!%p46_p2)
}
   0x8   :  { %s50_s15 = scalar_lea.vmem %s15_s7, 128  ;;  %p55_p4 = scmp.lt.s32.totalorder %s15_s7, %s15_s7 }
   0x9   :  { %p51_p3 = scmp.ne.s32.totalorder %s15_s7, %s50_s15  ;;  %p56_p5 = scmp.lt.s32.totalorder %s50_s15, %s50_s15 }
   0xb   :  { %p57_p6 = por %p56_p5, %p55_p4 }
   0xd   :  { %p58_p7 = pnand %p57_p6, %p51_p3 }
   0xf   :  { %61 = shalt.err (!%p58_p7)
}
  0x10   :  { %17 = dma.hbm_to_vmem [thread:$0]  %s124_s0, 128, %s15_s7, [#allocation3]  }
  0x11   :  { %84 = dma.done.wait [#allocation3], 128  }
  0x12   :  { %85 = vsyncadd [#allocation3], 4294967168  ;;  %s89_s18 = smov [#allocation5]   ;;  %v21_v0 = vld [vmem:[#allocation2] sm:$0xff] }
  0x13   :  { %s29_s19 = sshll.u32 %s89_s18, 4  ;;  %22 = vst [vmem:[#allocation5] sm:$0xff] %v21_v0  ;;  %s30_s19 = int_to_ptr.vmem [resolvable:$true] %s29_s19 }
  0x14   :  { %s62_s20 = scalar_lea.vmem %s30_s19, 128  ;;  %p67_p9 = scmp.lt.s32.totalorder %s30_s19, %s30_s19 }
  0x15   :  { %p63_p8 = scmp.ne.s32.totalorder %s30_s19, %s62_s20  ;;  %p68_p10 = scmp.lt.s32.totalorder %s62_s20, %s62_s20 }
  0x17   :  { %p69_p11 = por %p68_p10, %p67_p9 }
  0x19   :  { %p70_p12 = pnand %p69_p11, %p63_p8 }
  0x1b   :  { %73 = shalt.err (!%p70_p12)
}
  0x1c   :  { %s74_s23 = scalar_lea.hbm %s125_s1, 128 }
  0x1d   :  { %p75_p13 = scmp.ne.s32.totalorder %s125_s1, %s74_s23  ;;  %p78_p0 = scmp.lt.u32.totalorder %s74_s23, %s125_s1 }
  0x1f   :  { %p80_p1 = pnand %p78_p0, %p75_p13 }
  0x21   :  { %83 = shalt.err (!%p80_p1)
}
  0x22   :  { %32 = dma.vmem_to_hbm [thread:$0]  %s30_s19, 128, %s125_s1, [#allocation4]  }
  0x23   :  { %86 = dma.done.wait [#allocation4], 128  }
  0x24   :  { %87 = vsyncadd [#allocation4], 4294967168 }
  0x25   :  { %36 = vsyncpa [#allocation3], 1 }
  0x26   :  { %37 = vsyncpa [#allocation4], 1 }

// kernel: tpu_custom_call.1
= control target key start
LH: loop header
LB: loop body
LE: loop exit
PB: predicated region body
PF: predicated region fallthrough
CT: control target
= control target key end

     0   :  { %s2964_s0 = inlined_call_operand.hbm [shape: f32[2,8,32], index: 0, kind: input, shape index: {}]   ;;  %s2965_s1 = inlined_call_operand.hbm [shape: bf16[32,96], index: 1, kind: input, shape index: {}]   ;;  %s2966_s2 = inlined_call_operand.vmem [shape: f32[1,96], index: 2, kind: input, shape index: {}]   ;;  %s2967_s3 = inlined_call_operand.hbm [shape: bf16[32,32], index: 3, kind: input, shape index: {}]   ;;  %s2968_s4 = inlined_call_operand.vmem [shape: f32[1,32], index: 4, kind: input, shape index: {}]   ;;  %s2969_s5 = inlined_call_operand.vmem [shape: f32[1,32], index: 5, kind: input, shape index: {}]   ;;  %s2970_s6 = inlined_call_operand.vmem [shape: f32[1,32], index: 6, kind: input, shape index: {}]   ;;  %s2971_s7 = inlined_call_operand.vmem [shape: bf16[32,32], index: 7, kind: input, shape index: {}]   ;;  %s2972_s8 = inlined_call_operand.vmem [shape: f32[1,32], index: 8, kind: input, shape index: {}]   ;;  %s2973_s9 = inlined_call_operand.vmem [shape: f32[1,32], index: 9, kind: input, shape index: {}]   ;;  %s2974_s10 = inlined_call_operand.vmem [shape: f32[1,32], index: 10, kind: input, shape index: {}]   ;;  %s2975_s11 = inlined_call_operand.hbm [shape: f32[2,8,32], index: 11, kind: output, shape index: {}]  }
   0x1   :  { %2983 = sst [smem:[#allocation18_spill]] %s2964_s0 }
   0x2   :  { %2984 = sst [smem:[#allocation19_spill]] %s2973_s9 }
   0x3   :  { %2985 = sst [smem:[#allocation20_spill]] %s2974_s10 }
   0x4   :  { %2986 = sst [smem:[#allocation21_spill]] %s2975_s11 }
   0x5   :  { %16 = vsyncpa [#allocation6], 0 }
   0x6   :  { %18 = vsyncpa [#allocation6 + $0x1], 0 }
   0x7   :  { %19 = vsyncpa [#allocation9], 0 }
   0x8   :  { %20 = vsyncpa [#allocation7], 0 }
   0x9   :  { %22 = vsyncpa [#allocation7 + $0x1], 0  ;;  %s2478_s17 = smov 0   ;;  %s2480_s18 = smov 0  }
   0xa   :  { %s2482_s19 = smov 0   ;;  %s2484_s20 = smov 0  }
   0xb   :  { %s2486_s21 = smov 0   ;;  %s2488_s22 = smov 0  }
   0xc LB: > { %2987 = sst [smem:[#allocation15_spill]] %s2377_s17  ;;  %s1961_s23 = sadd.s32 4294967295, %s2397_s22   ;;  %s2397_s22 = sphi %s2488_s22, %s28_s22   ;;  %s2393_s21 = sphi %s2486_s21, %s3016_s21   ;;  %s2389_s20 = sphi %s2484_s20, %s3015_s20   ;;  %s2385_s19 = sphi %s2482_s19, %s3014_s19   ;;  %s2381_s18 = sphi %s2480_s18, %s3013_s18   ;;  %s2377_s17 = sphi %s2478_s17, %s3012_s17  }
   0xd   : > { %2988 = sst [smem:[#allocation16_spill]] %s2389_s20  ;;  %s1962_s24 = sadd.s32 4294967294, %s2397_s22  }
   0xe   : > { %p60_p0 = scmp.ne.s32.totalorder %s2381_s18, %s2377_s17  ;;  %p2512_p1 = scmp.eq.s32.totalorder %s1961_s23, 0 }
   0xf   : > { %p2516_p2 = scmp.eq.s32.totalorder %s1961_s23, 1  ;;  %p302_p3 = scmp.eq.s32.totalorder %s1962_s24, 1 }
  0x10   : > { %s2989_s25 = scalar_select %p2512_p1, 1, 0 }
  0x11   : > { %p2522_p4 = por %p2512_p1, %p60_p0  ;;  %p1963_p5 = scmp.ge.s32.totalorder %s2397_s22, 1 }
  0x12   : > { %p2527_p6 = por %p302_p3, %p60_p0  ;;  %p309_p7 = scmp.lt.s32.totalorder %s2397_s22, 3 }
  0x13   : > { %s2991_s27 = scalar_select %p2522_p4, 1, 0 }
  0x14   : > { %s2992_s28 = scalar_select %p2527_p6, 1, 0 }
  0x15   : > { %p2532_p8 = pnand %p1963_p5, %p309_p7  ;;  %s2399_s30 = smov [#allocation8]  }
  0x16   : > { %2993 = sst [smem:[#allocation17_spill]] %s2992_s28  ;;  %s321_s12 = sshll.u32 %s2399_s30, 4  ;;  %s2536_s12 = int_to_ptr.vmem [resolvable:$true] %s321_s12 }
  0x17   : > { %p2113_p9 = pneg %p2532_p8  ;;  %s2400_s14 = smov [#allocation10]  }
  0x18   : > { %s337_s15 = sshll.u32 %s2400_s14, 4  ;;  %s2225_s24 = scalar_lea.hbm %s2965_s1, 256  ;;  %s2547_s15 = int_to_ptr.vmem [resolvable:$true] %s337_s15 }
  0x19   : > { %p2543_p11 = pnand %p2113_p9, %p2512_p1  ;;  %p2226_p12 = scmp.ne.s32.totalorder %s2965_s1, %s2225_s24 }
  0x1a   : > { %p2232_p5 = scmp.lt.u32.totalorder %s2225_s24, %s2965_s1 }
  0x1b   : > { %p2227_p13 = pneg %p2543_p11 }
  0x1d   : > { %p2228_p0 = pnand %p2227_p13, %p2226_p12 }
  0x1f   : > { %p2229_p3 = pneg %p2228_p0 }
  0x21   : > { %p2234_p7 = pnand %p2232_p5, %p2229_p3 }
  0x23   : > { %2237 = shalt.err (!%p2234_p7)
}
  0x24   : > { %s2238_s14 = scalar_lea.vmem %s2536_s12, 256  ;;  %p2246_p1 = scmp.lt.s32.totalorder %s2536_s12, %s2536_s12 }
  0x25   : > { %p2239_p9 = scmp.ne.s32.totalorder %s2536_s12, %s2238_s14  ;;  %p2247_p12 = scmp.lt.s32.totalorder %s2238_s14, %s2238_s14 }
  0x27   : > { %p2241_p10 = pnand %p2239_p9, %p2227_p13  ;;  %p2248_p0 = por %p2247_p12, %p2246_p1 }
  0x29   : > { %p2242_p6 = pneg %p2241_p10 }
  0x2b   : > { %p2249_p4 = pnand %p2248_p0, %p2242_p6 }
  0x2d   : > { %2252 = shalt.err (!%p2249_p4)
}
  0x2e   : > { %s2401_s11 = smov 64   ;;  %s2402_s17 = smov 4  }
  0x2f   : > { %2116 = dma.hbm_to_vmem [thread:$0]  (!%p2543_p11), %s2965_s1, 256, %s2536_s12, [#allocation9], %s2401_s11, %s2401_s11, %s2402_s17  }
  0x30   : > { %s2253_s30 = scalar_lea.hbm %s2967_s3, 256 }
  0x31   : > { %p2254_p1 = scmp.ne.s32.totalorder %s2967_s3, %s2253_s30  ;;  %p2260_p10 = scmp.lt.u32.totalorder %s2253_s30, %s2967_s3 }
  0x33   : > { %p2256_p4 = pnand %p2254_p1, %p2227_p13 }
  0x35   : > { %p2257_p6 = pneg %p2256_p4 }
  0x37   : > { %p2262_p3 = pnand %p2260_p10, %p2257_p6 }
  0x39   : > { %2265 = shalt.err (!%p2262_p3)
}
  0x3a   : > { %s2266_s12 = scalar_lea.vmem %s2547_s15, 256  ;;  %p2274_p12 = scmp.lt.s32.totalorder %s2547_s15, %s2547_s15 }
  0x3b   : > { %p2267_p5 = scmp.ne.s32.totalorder %s2547_s15, %s2266_s12  ;;  %p2275_p0 = scmp.lt.s32.totalorder %s2266_s12, %s2266_s12 }
  0x3d   : > { %p2269_p7 = pnand %p2267_p5, %p2227_p13  ;;  %p2276_p1 = por %p2275_p0, %p2274_p12 }
  0x3f   : > { %p2270_p9 = pneg %p2269_p7 }
  0x41   : > { %p2277_p4 = pnand %p2276_p1, %p2270_p9 }
  0x43   : > { %2280 = shalt.err (!%p2277_p4)
}
  0x44   : > { %2119 = dma.hbm_to_vmem [thread:$0]  (!%p2543_p11), %s2967_s3, 256, %s2547_s15, [#allocation9], %s2401_s11, %s2401_s11, %s2402_s17  }
  0x45   : > { %s40_s20 = sadd.s32 1, %s2393_s21  ;;  %s47_s28 = sadd.s32 1, %s2385_s19 }
  0x46   : > { %p42_p13 = scmp.ge.s32.totalorder %s40_s20, 2  ;;  %p54_p6 = scmp.ne.s32.totalorder %s2385_s19, %s2381_s18 }
  0x47   : > { %p55_p10 = scmp.eq.s32.totalorder %s2397_s22, 0  ;;  %p2130_p3 = scmp.lt.s32.totalorder %s2397_s22, 2 }
  0x48   : > { %s3018_s20 = smov (%p42_p13, %s40_s20), 0  ;;  %p2611_p7 = por %p2516_p2, %p54_p6 }
  0x49   : > { %p56_p5 = por %p55_p10, %p54_p6  ;;  %s44_s16 = ssub.s32 %s2393_s21, %s3018_s20 }
  0x4a   : > { %s2996_s13 = scalar_select %p2611_p7, 1, 0 }
  0x4b   : > { %s372_s23 = sand.u32 1, %s2385_s19   ;;  %p45_p9 = scmp.eq.s32.totalorder %s44_s16, 0 }
  0x4c   : > { %s1967_s15 = sshll.u32 %s372_s23, 3  ;;  %s1968_s11 = sshll.u32 %s2393_s21, 7 }
  0x4d   : > { %s2620_s17 = scalar_select %p45_p9, %s2385_s19, %s47_s28  }
  0x4e   : > { %s2997_s0 = sld [smem:[#allocation18_spill]]  ;;  %s376_s26 = scalar_lea.vmem [#allocation5], %s1967_s15 }
  0x4f   : > { %s383_s12 = sshll.u32 %s376_s26, 4  ;;  %p2629_p2 = pnand %p2130_p3, %p56_p5  ;;  %s2633_s12 = int_to_ptr.vmem [resolvable:$true] %s383_s12 }
  0x50   : > { %s373_s10 = scalar_lea.sflag [#allocation6], %s372_s23 }
  0x51   : > { %p2283_p12 = pneg %p2629_p2 }
  0x54   : > { %s2625_s14 = scalar_lea.hbm %s2997_s0, %s1968_s11  ;;  %s2286_s11 = scalar_lea.hbm %s2997_s0, 256 }
  0x55   : > { %s2281_s28 = scalar_lea.hbm %s2625_s14, 128  ;;  %p2287_p4 = scmp.lt.u32.totalorder %s2625_s14, %s2997_s0 }
  0x56   : > { %p2282_p11 = scmp.ne.s32.totalorder %s2625_s14, %s2281_s28  ;;  %p2288_p13 = scmp.lt.u32.totalorder %s2286_s11, %s2281_s28 }
  0x57   : > { %p2290_p10 = scmp.lt.u32.totalorder %s2281_s28, %s2625_s14 }
  0x58   : > { %p2284_p0 = pnand %p2283_p12, %p2282_p11  ;;  %p2289_p6 = por %p2288_p13, %p2287_p4 }
  0x5a   : > { %p2285_p1 = pneg %p2284_p0  ;;  %p2291_p3 = por %p2290_p10, %p2289_p6 }
  0x5c   : > { %p2292_p5 = pnand %p2291_p3, %p2285_p1 }
  0x5e   : > { %2295 = shalt.err (!%p2292_p5)
}
  0x5f   : > { %s2296_s23 = scalar_lea.vmem %s2633_s12, 128  ;;  %s2403_s26 = smov [#allocation5]  }
  0x60   : > { %p2297_p9 = scmp.ne.s32.totalorder %s2633_s12, %s2296_s23  ;;  %s2301_s16 = sshll.u32 %s2403_s26, 4  ;;  %s2302_s16 = int_to_ptr.vmem [resolvable:$false] %s2301_s16 }
  0x61   : > { %s2303_s15 = scalar_lea.vmem %s2302_s16, 256  ;;  %p2304_p7 = scmp.lt.s32.totalorder %s2633_s12, %s2302_s16 }
  0x62   : > { %p2299_p11 = pnand %p2297_p9, %p2283_p12  ;;  %p2305_p4 = scmp.lt.s32.totalorder %s2303_s15, %s2296_s23 }
  0x64   : > { %p2300_p0 = pneg %p2299_p11  ;;  %p2306_p13 = por %p2305_p4, %p2304_p7 }
  0x66   : > { %p2307_p6 = pnand %p2306_p13, %p2300_p0 }
  0x68   : > { %2310 = shalt.err (!%p2307_p6)
}
  0x69   : > { %2123 = dma.hbm_to_vmem [thread:$0]  (!%p2629_p2), %s2625_s14, 128, %s2633_s12, %s373_s10  }
  0x6a   : > { %392 = sbr.rel (%p2532_p8) target bundleno = 2292 (0x8f4), region = 64  ;;  %s2663_s28 = sand.u32 (!%p2532_p8), 1, %s2381_s18  }
  0x6b   : > { %s1970_s11 = sshll.u32 (!%p2532_p8), %s2663_s28, 3  ;;  %s395_s24 = scalar_lea.sflag (!%p2532_p8), [#allocation6], %s2663_s28 }
  0x6c   : > { %s398_s30 = scalar_lea.vmem (!%p2532_p8), [#allocation5], %s1970_s11  ;;  %p2999_p7 = scmp.ne.s32.totalorder (!%p2532_p8), %s2991_s27, 0 }
  0x71   : > { %2364 = dma.done.wait (%p2999_p7), %s395_s24, 128  }
  0x72   : > { %2366 = vsyncadd (%p2999_p7), %s395_s24, 4294967168  ;;  %p3000_p2 = scmp.ne.s32.totalorder %s2989_s25, 0 }
  0x74   : > { %2368 = dma.done.wait (%p3000_p2), [#allocation9], 512  }
  0x75   : > { %2370 = vsyncadd (%p3000_p2), [#allocation9], 4294966784  ;;  %v2404_v0 = vmov 0.0   ;;  %vm2405_vm0 = vmmov 0   ;;  %v2199_v1 = vld [vmem:[#allocation8] sm:$0xff]   ;;  %v2200_v2 = vld [vmem:[#allocation8 + $0x8] sm:$0xff]   ;;  %v530_v14 = vlaneseq }
  0x76   : > { %2029 = vmatprep.subr.bf16.mxu0 %v2404_v0  ;;  %2033 = vmatprep.mubr.msk.bf16.mxu0 %vm2405_vm0, %v2404_v0  ;;  %v2683_v3 = vld [vmem:[%s398_s30] sm:$0xff]  ;;  %vm475_vm1 = vcmask 261120   ;;  %v1974_v5 = vld [vmem:[%s2966_s2] ss:$0 sm:$0xff]  ;;  %s2406_s29 = smov 104   ;;  %s2407_s14 = smov 120  }
  0x77   : > { %2037 = vmatprep.subr.bf16.mxu1 %v2404_v0  ;;  %2039 = vmatprep.mubr.msk.bf16.mxu1 %vm2405_vm0, %v2404_v0  ;;  %v451_v4 = vpack.c.bf16 %v2683_v3, %v2683_v3  ;;  %s2408_s12 = smov 96   ;;  %s2409_s9 = smov 112   ;;  %v2410_v12 = vmov 1983009808   ;;  %v2411_v15 = vmov 1934713408  }
  0x78   : > { %2030 = vmatpush3.bf16.msra.mxu0 %v2199_v1  ;;  %v528_v13 = vunpack.c.l.s4 %v2410_v12  ;;  %v545_v16 = vunpack.c.l.s4 %v2411_v15  ;;  %v531_v18 = vshrl.u32 %v530_v14, 7  ;;  %v2412_v35 = vmov 0   ;;  %s2413_s10 = smov 64   ;;  %s2414_s23 = smov 16  }
  0x79   : > { %2031 = vmatprep.subr.bf16.mxu0 %v2404_v0  ;;  %vm692_vm2 = vcmask 60416   ;;  %vm1066_vm3 = vcmask 64512   ;;  %vm1306_vm4 = vcmask 1043456   ;;  %s2415_s26 = smov 8   ;;  %s2416_s16 = smov 24   ;;  %vm1637_vm5 = vcmask 130048  }
  0x7a   : > { %v529_v17 = vunpack.c.0.s8 %v528_v13  ;;  %v546_v19 = vunpack.c.0.s8 %v545_v16  ;;  %vm1639_vm6 = vcmask 195584   ;;  %s3002_s30 = sld [smem:[#allocation19_spill]]  ;;  %s1845_s15 = scalar_lea.sflag [#allocation7], %s2663_s28 }
  0x7b   : > { %p3005_p12 = scmp.ne.s32.totalorder %s2996_s13, 0 }
  0x7c   : > { %2032 = vmatpush3.bf16.msra.mxu0 %v2200_v2  ;;  %v2701_v20 = vsub.s32 %v529_v17, %v531_v18  ;;  %v2709_v24 = vsub.s32 %v546_v19, %v531_v18 }
  0x7d   : > { %2043 = vmatprep.subr.bf16.mxu0 %v2404_v0 }
  0x7f   : > { %2034 = vmatmul.mubr.msk.bf16.vlgmr.msra.gmra.mrb[0].mxu0 %vm475_vm1, %v451_v4 }
  0x80   : > { %2045 = vmatprep.mubr.msk.bf16.mxu0 %vm2405_vm0, %v2404_v0 }
 0x152   : > { %v513_v6 = vpop.f32.mrb[0].mxu0 }
 0x153   : > { %v514_v7 = vadd.f32 %v1974_v5, %v513_v6  ;;  %v2035_v8 = vpop.f32.mrb[1].mxu0 }
 0x154   : > { %v516_v9 = vpop.f32.mrb[2].mxu0 }
 0x155   : > { %v2695_v10 = vpack.c.bf16 %v514_v7, %v514_v7  ;;  %v2036_v11 = vpop.f32.mrb[3].mxu0 }
 0x157   : > { %525 = vrot.lane.b32.xlu1 %v2695_v10, %s2406_s29  ;;  %521 = vrot.lane.b32.xlu0 %v2695_v10, %s2407_s14  ;;  %v533_v31 = vrot.slane %v2695_v10, %v2701_v20  ;;  %s3003_s29 = sld [smem:[#allocation20_spill]] }
 0x15b   : > { %697 = vrot.lane.b32.xlu1 %v2695_v10, %s2408_s12  ;;  %523 = vrot.lane.b32.xlu0 %v2695_v10, %s2409_s9 }
 0x1c9   : > { %v2703_v21 = vpop.permute.xlu1 %525  ;;  %v2705_v22 = vpop.permute.xlu0 %521 }
 0x1ca   : > { %v575_v23 = vrot.slane %v2703_v21, %v2701_v20  ;;  %v567_v25 = vrot.slane %v2705_v22, %v2701_v20  ;;  %699 = vrot.lane.b32.xlu0 %v2705_v22, %s2408_s12 }
 0x1cc   : > { %v576_v26 = vcombine.low %v567_v25, %v575_v23  ;;  %v577_v27 = vcombine.high %v567_v25, %v575_v23 }
 0x1cd   : > { %v2714_v28 = vpop.permute.xlu0 %523  ;;  %v698_v23 = vpop.permute.xlu1 %697 }
 0x1ce   : > { %v584_v29 = vrot.slane %v576_v26, %v2709_v24  ;;  %v541_v30 = vrot.slane %v2714_v28, %v2701_v20  ;;  %703 = vrot.lane.b32.xlu0 %v2703_v21, %s2408_s12  ;;  %701 = vrot.lane.b32.xlu1 %v2714_v28, %s2408_s12  ;;  %v591_v32 = vrot.slane %v577_v27, %v2709_v24  ;;  %s444_s12 = scalar_lea.vmem [#allocation11], %s1970_s11  ;;  %s2417_s11 = smov [#allocation11]  }
 0x1cf   : > { %s1859_s9 = sshll.u32 %s444_s12, 4  ;;  %s2916_s9 = int_to_ptr.vmem [resolvable:$true] %s1859_s9 }
 0x1d0   : > { %v542_v33 = vcombine.low %v533_v31, %v541_v30  ;;  %v543_v34 = vcombine.high %v533_v31, %v541_v30  ;;  %v592_v36 = vcombine.high %v584_v29, %v2412_v35  ;;  %v593_v39 = vcombine.high %v591_v32, %v2412_v35  ;;  %s2311_s24 = scalar_lea.vmem %s2916_s9, 128 }
 0x1d1   : > { %v599_v40 = vshrl.u32 %v584_v29, 16  ;;  %v615_v46 = vshrl.u32 %v591_v32, 16  ;;  %v712_v30 = vrot.slane %v698_v23, %v2701_v20  ;;  %p2312_p8 = scmp.ne.s32.totalorder %s2916_s9, %s2311_s24 }
 0x1d2   : > { %v550_v37 = vrot.slane %v542_v33, %v2709_v24  ;;  %v557_v38 = vrot.slane %v543_v34, %v2709_v24  ;;  %v607_v45 = vshrl.u32 %v592_v36, 16  ;;  %v623_v53 = vshrl.u32 %v593_v39, 16 }
 0x1d3   : > { %p2313_p1 = pnand %p2312_p8, %p3005_p12 }
 0x1d4   : > { %v558_v41 = vcombine.high %v550_v37, %v2412_v35  ;;  %v559_v42 = vcombine.high %v557_v38, %v2412_v35  ;;  %v596_v43 = vpack.i.b16 %v584_v29, %v550_v37  ;;  %v598_v44 = vshrl.u32 %v550_v37, 16 }
 0x1d5   : > { %v612_v47 = vpack.i.b16 %v591_v32, %v557_v38  ;;  %v614_v48 = vshrl.u32 %v557_v38, 16  ;;  %p2314_p10 = pneg %p2313_p1 }
 0x1d6   : > { %v600_v49 = vpack.i.b16 %v599_v40, %v598_v44  ;;  %v604_v50 = vpack.i.b16 %v592_v36, %v558_v41  ;;  %v606_v51 = vshrl.u32 %v558_v41, 16  ;;  %v620_v52 = vpack.i.b16 %v593_v39, %v559_v42 }
 0x1d7   : > { %v616_v54 = vpack.i.b16 %v615_v46, %v614_v48  ;;  %v622_v55 = vshrl.u32 %v559_v42, 16  ;;  %v626_v56 = vcombine.low %v596_v43, %v612_v47 }
 0x1d8   : > { %v608_v57 = vpack.i.b16 %v607_v45, %v606_v51  ;;  %v634_v58 = vcombine.low %v604_v50, %v620_v52 }
 0x1d9   : > { %v624_v59 = vpack.i.b16 %v623_v53, %v622_v55  ;;  %v651_v60 = vcombine.low %v600_v49, %v616_v54  ;;  %v633_v61 = vrot.slane %v626_v56, %v2701_v20 }
 0x1da   : > { %v641_v62 = vrot.slane %v634_v58, %v2701_v20 }
 0x1db   : > { %v659_v63 = vcombine.low %v608_v57, %v624_v59  ;;  %v658_v2 = vrot.slane %v651_v60, %v2701_v20 }
 0x1dc   : > { %v642_v1 = vcombine.low %v633_v61, %v641_v62 }
 0x1dd   : > { %v666_v4 = vrot.slane %v659_v63, %v2701_v20 }
 0x1de   : > { %v649_v5 = vrot.slane %v642_v1, %v2709_v24 }
 0x1df   : > { %v667_v6 = vcombine.low %v658_v2, %v666_v4 }
 0x1e0   : > { %v650_v7 = vcombine.high %v649_v5, %v2412_v35  ;;  %v680_v12 = vshrl.u32 %v649_v5, 16 }
 0x1e1   : > { %v674_v8 = vrot.slane %v667_v6, %v2709_v24 }
 0x1e2   : > { %v688_v16 = vshrl.u32 %v650_v7, 16 }
 0x1e3   : > { %v675_v9 = vcombine.high %v674_v8, %v2412_v35  ;;  %v678_v11 = vpack.i.b16 %v674_v8, %v649_v5  ;;  %v681_v13 = vshrl.u32 %v674_v8, 16 }
 0x1e5   : > { %v682_v14 = vpack.i.b16 %v681_v13, %v680_v12  ;;  %v686_v15 = vpack.i.b16 %v675_v9, %v650_v7  ;;  %v689_v17 = vshrl.u32 %v675_v9, 16  ;;  %693 = vst.msk [vmem:[#allocation2] sm:$0xf] %vm692_vm2, %v678_v11 }
 0x1e7   : > { %v690_v18 = vpack.i.b16 %v689_v17, %v688_v16  ;;  %694 = vst.msk [vmem:[#allocation2 + $0x4] sm:$0xf] %vm692_vm2, %v682_v14  ;;  %695 = vst.msk [vmem:[#allocation2 + $0x8] sm:$0xf] %vm692_vm2, %v686_v15 }
 0x1e9   : > { %696 = vst.msk [vmem:[#allocation2 + $0xc] sm:$0xf] %vm692_vm2, %v690_v18 }
 0x23c   : > { %v700_v19 = vpop.permute.xlu0 %699 }
 0x23d   : > { %v746_v26 = vrot.slane %v700_v19, %v2701_v20 }
 0x240   : > { %v704_v25 = vpop.permute.xlu0 %703  ;;  %v702_v27 = vpop.permute.xlu1 %701 }
 0x241   : > { %v754_v29 = vrot.slane %v704_v25, %v2701_v20  ;;  %v720_v31 = vrot.slane %v702_v27, %v2701_v20 }
 0x243   : > { %v755_v32 = vcombine.low %v746_v26, %v754_v29  ;;  %v756_v33 = vcombine.high %v746_v26, %v754_v29  ;;  %v721_v34 = vcombine.low %v712_v30, %v720_v31  ;;  %v722_v36 = vcombine.high %v712_v30, %v720_v31 }
 0x245   : > { %v763_v37 = vrot.slane %v755_v32, %v2709_v24  ;;  %v770_v38 = vrot.slane %v756_v33, %v2709_v24  ;;  %v729_v39 = vrot.slane %v721_v34, %v2709_v24  ;;  %v736_v40 = vrot.slane %v722_v36, %v2709_v24  ;;  %v1058_v32 = vld [vmem:[#allocation2] sm:$0xf]  ;;  %v1059_v36 = vld [vmem:[#allocation2 + $0x4] sm:$0xf] }
 0x247   : > { %v771_v41 = vcombine.high %v763_v37, %v2412_v35  ;;  %v772_v42 = vcombine.high %v770_v38, %v2412_v35  ;;  %v778_v43 = vshrl.u32 %v763_v37, 16  ;;  %v794_v44 = vshrl.u32 %v770_v38, 16 }
 0x248   : > { %v737_v45 = vcombine.high %v729_v39, %v2412_v35  ;;  %v738_v46 = vcombine.high %v736_v40, %v2412_v35  ;;  %v777_v47 = vshrl.u32 %v729_v39, 16  ;;  %v793_v48 = vshrl.u32 %v736_v40, 16 }
 0x249   : > { %v775_v49 = vpack.i.b16 %v763_v37, %v729_v39  ;;  %v786_v50 = vshrl.u32 %v771_v41, 16  ;;  %v791_v51 = vpack.i.b16 %v770_v38, %v736_v40  ;;  %v802_v52 = vshrl.u32 %v772_v42, 16  ;;  %v1060_v38 = vld [vmem:[#allocation2 + $0x8] sm:$0xf]  ;;  %v1061_v39 = vld [vmem:[#allocation2 + $0xc] sm:$0xf] }
 0x24a   : > { %v785_v53 = vshrl.u32 %v737_v45, 16  ;;  %v801_v54 = vshrl.u32 %v738_v46, 16  ;;  %v779_v55 = vpack.i.b16 %v778_v43, %v777_v47  ;;  %v783_v56 = vpack.i.b16 %v771_v41, %v737_v45 }
 0x24b   : > { %v795_v57 = vpack.i.b16 %v794_v44, %v793_v48  ;;  %v799_v58 = vpack.i.b16 %v772_v42, %v738_v46  ;;  %v805_v59 = vcombine.low %v775_v49, %v791_v51 }
 0x24c   : > { %v787_v60 = vpack.i.b16 %v786_v50, %v785_v53  ;;  %v803_v61 = vpack.i.b16 %v802_v52, %v801_v54 }
 0x24d   : > { %v813_v62 = vcombine.low %v783_v56, %v799_v58  ;;  %v830_v63 = vcombine.low %v779_v55, %v795_v57  ;;  %v812_v2 = vrot.slane %v805_v59, %v2701_v20 }
 0x24e   : > { %v838_v1 = vcombine.low %v787_v60, %v803_v61 }
 0x24f   : > { %v820_v4 = vrot.slane %v813_v62, %v2701_v20  ;;  %v837_v5 = vrot.slane %v830_v63, %v2701_v20 }
 0x250   : > { %v845_v6 = vrot.slane %v838_v1, %v2701_v20 }
 0x251   : > { %v821_v7 = vcombine.low %v812_v2, %v820_v4 }
 0x252   : > { %v846_v8 = vcombine.low %v837_v5, %v845_v6 }
 0x253   : > { %v828_v9 = vrot.slane %v821_v7, %v2709_v24 }
 0x254   : > { %v853_v11 = vrot.slane %v846_v8, %v2709_v24 }
 0x255   : > { %v829_v12 = vcombine.high %v828_v9, %v2412_v35  ;;  %v859_v15 = vshrl.u32 %v828_v9, 16 }
 0x256   : > { %v854_v13 = vcombine.high %v853_v11, %v2412_v35  ;;  %v857_v14 = vpack.i.b16 %v853_v11, %v828_v9  ;;  %v860_v16 = vshrl.u32 %v853_v11, 16 }
 0x257   : > { %v867_v19 = vshrl.u32 %v829_v12, 16 }
 0x258   : > { %v861_v17 = vpack.i.b16 %v860_v16, %v859_v15  ;;  %v865_v18 = vpack.i.b16 %v854_v13, %v829_v12  ;;  %v868_v23 = vshrl.u32 %v854_v13, 16  ;;  %871 = vst.msk [vmem:[#allocation3] sm:$0xf] %vm692_vm2, %v857_v14 }
 0x25a   : > { %v869_v25 = vpack.i.b16 %v868_v23, %v867_v19  ;;  %872 = vst.msk [vmem:[#allocation3 + $0x4] sm:$0xf] %vm692_vm2, %v861_v17  ;;  %873 = vst.msk [vmem:[#allocation3 + $0x8] sm:$0xf] %vm692_vm2, %v865_v18 }
 0x25c   : > { %874 = vst.msk [vmem:[#allocation3 + $0xc] sm:$0xf] %vm692_vm2, %v869_v25 }
 0x25f   : > { %v1062_v26 = vld [vmem:[#allocation3] sm:$0xf] }
 0x260   : > { %v1071_v27 = vsel %vm1066_vm3, %v1062_v26, 0 }
 0x261   : > { %2038 = vmatpush3.bf16.xpose.msra.mxu1 %v1071_v27  ;;  %v1063_v29 = vld [vmem:[#allocation3 + $0x4] sm:$0xf]  ;;  %v1064_v31 = vld [vmem:[#allocation3 + $0x8] sm:$0xf] }
 0x262   : > { %v1117_v30 = vsel %vm1066_vm3, %v1063_v29, 0  ;;  %2049 = vmatprep.subr.bf16.mxu1 %v2404_v0  ;;  %v1163_v34 = vsel %vm1066_vm3, %v1064_v31, 0 }
 0x263   : > { %2044 = vmatpush3.bf16.xpose.msra.mxu0 %v1117_v30  ;;  %v1065_v33 = vld [vmem:[#allocation3 + $0xc] sm:$0xf] }
 0x264   : > { %2055 = vmatprep.subr.bf16.mxu0 %v2404_v0  ;;  %v1209_v37 = vsel %vm1066_vm3, %v1065_v33, 0 }
 0x268   : > { %2040 = vmatmul.mubr.msk.bf16.vlgmr.msra.gmra.mrb[0].mxu1 %vm1066_vm3, %v1058_v32 }
 0x269   : > { %2050 = vmatpush3.bf16.xpose.msra.mxu1 %v1163_v34  ;;  %2051 = vmatprep.mubr.msk.bf16.mxu1 %vm2405_vm0, %v2404_v0 }
 0x26a   : > { %2046 = vmatmul.mubr.msk.bf16.vlgmr.msra.gmra.mrb[4].mxu0 %vm1066_vm3, %v1059_v36  ;;  %2061 = vmatprep.subr.bf16.mxu1 %v2404_v0 }
 0x26b   : > { %2056 = vmatpush3.bf16.xpose.msra.mxu0 %v1209_v37  ;;  %2057 = vmatprep.mubr.msk.bf16.mxu0 %vm2405_vm0, %v2404_v0 }
 0x26c   : > { %2067 = vmatprep.subr.bf16.mxu0 %v2404_v0 }
 0x270   : > { %2052 = vmatmul.mubr.msk.bf16.vlgmr.msra.gmra.mrb[4].mxu1 %vm1066_vm3, %v1060_v38 }
 0x271   : > { %2063 = vmatprep.mubr.msk.bf16.mxu1 %vm2405_vm0, %v2404_v0 }
 0x272   : > { %2058 = vmatmul.mubr.msk.bf16.vlgmr.msra.gmra.mrb[8].mxu0 %vm1066_vm3, %v1061_v39 }
 0x273   : > { %2069 = vmatprep.mubr.msk.bf16.mxu0 %vm2405_vm0, %v2404_v0 }
 0x33b   : > { %v1107_v40 = vpop.f32.mrb[0].mxu1 }
 0x33c   : > { %v2041_v41 = vpop.f32.mrb[1].mxu1  ;;  %v1251_v42 = vsel %vm1066_vm3, %v1107_v40, -inf }
 0x33d   : > { %1252 = vmax.xlane.f32.xlu1 %v1251_v42  ;;  %v1110_v43 = vpop.f32.mrb[2].mxu1  ;;  %v1153_v44 = vpop.f32.mrb[4].mxu0 }
 0x33e   : > { %v2042_v45 = vpop.f32.mrb[3].mxu1  ;;  %v2047_v46 = vpop.f32.mrb[5].mxu0  ;;  %v1254_v47 = vsel %vm1066_vm3, %v1153_v44, -inf }
 0x33f   : > { %1255 = vmax.xlane.f32.xlu0 %v1254_v47  ;;  %v1156_v48 = vpop.f32.mrb[6].mxu0 }
 0x340   : > { %v2048_v49 = vpop.f32.mrb[7].mxu0 }
 0x343   : > { %v1199_v50 = vpop.f32.mrb[4].mxu1 }
 0x344   : > { %v2053_v51 = vpop.f32.mrb[5].mxu1  ;;  %v1257_v52 = vsel %vm1066_vm3, %v1199_v50, -inf }
 0x345   : > { %v1202_v53 = vpop.f32.mrb[6].mxu1  ;;  %1258 = vmax.xlane.f32.xlu0 %v1257_v52  ;;  %v1245_v54 = vpop.f32.mrb[8].mxu0 }
 0x346   : > { %v2054_v55 = vpop.f32.mrb[7].mxu1  ;;  %v2059_v56 = vpop.f32.mrb[9].mxu0  ;;  %v1260_v57 = vsel %vm1066_vm3, %v1245_v54, -inf }
 0x347   : > { %1261 = vmax.xlane.f32.xlu1 %v1260_v57  ;;  %v1248_v58 = vpop.f32.mrb[10].mxu0 }
 0x348   : > { %v2060_v59 = vpop.f32.mrb[11].mxu0 }
 0x358   : > { %877 = vrot.lane.b32.xlu1 %v2705_v22, %s2413_s10 }
 0x35b   : > { %875 = vrot.lane.b32.xlu0 %v2695_v10, %s2413_s10 }
 0x35c   : > { %879 = vrot.lane.b32.xlu1 %v2714_v28, %s2413_s10 }
 0x35f   : > { %881 = vrot.lane.b32.xlu0 %v2703_v21, %s2413_s10 }
 0x3ca   : > { %v1253_v60 = vpop.xlane.xlu1 %1252 }
 0x3cb   : > { %v1263_v61 = vsub.f32 %v1107_v40, %v1253_v60 }
 0x3cc   : > { %v1256_v62 = vpop.xlane.xlu0 %1255 }
 0x3cd   : > { %v1267_v63 = vmul.f32 1.442695, %v1263_v61  ;;  %v1264_v1 = vsub.f32 %v1153_v44, %v1256_v62 }
 0x3cf   : > { %2205 = vpow2.f32 %v1267_v63  ;;  %v1269_v2 = vmul.f32 1.442695, %v1264_v1 }
 0x3d1   : > { %2207 = vpow2.f32 %v1269_v2 }
 0x3d2   : > { %v1259_v4 = vpop.xlane.xlu0 %1258 }
 0x3d3   : > { %v1265_v5 = vsub.f32 %v1199_v50, %v1259_v4 }
 0x3d4   : > { %v1262_v6 = vpop.xlane.xlu1 %1261 }
 0x3d5   : > { %v1271_v7 = vmul.f32 1.442695, %v1265_v5  ;;  %v1266_v8 = vsub.f32 %v1245_v54, %v1262_v6 }
 0x3d6   : > { %v876_v22 = vpop.permute.xlu0 %875 }
 0x3d7   : > { %2209 = vpow2.f32 %v1271_v7  ;;  %v1273_v10 = vmul.f32 1.442695, %v1266_v8  ;;  %v890_v17 = vrot.slane %v876_v22, %v2701_v20 }
 0x3d8   : > { %v878_v9 = vpop.permute.xlu1 %877 }
 0x3d9   : > { %v2794_v28 = vpop.eup %2205  ;;  %2211 = vpow2.f32 %v1273_v10  ;;  %v924_v13 = vrot.slane %v878_v9, %v2701_v20 }
 0x3da   : > { %v882_v21 = vpop.permute.xlu0 %881  ;;  %v1275_v11 = vsel %vm1066_vm3, %v2794_v28, 0.0 }
 0x3db   : > { %v2798_v12 = vpop.eup %2207  ;;  %v932_v14 = vrot.slane %v882_v21, %v2701_v20  ;;  %1276 = vadd.xlane.f32.xlu1 %v1275_v11 }
 0x3dc   : > { %v880_v15 = vpop.permute.xlu1 %879  ;;  %v1278_v16 = vsel %vm1066_vm3, %v2798_v12, 0.0 }
 0x3dd   : > { %v933_v18 = vcombine.low %v924_v13, %v932_v14  ;;  %v934_v19 = vcombine.high %v924_v13, %v932_v14  ;;  %v898_v23 = vrot.slane %v880_v15, %v2701_v20  ;;  %1279 = vadd.xlane.f32.xlu0 %v1278_v16 }
 0x3df   : > { %v941_v25 = vrot.slane %v933_v18, %v2709_v24  ;;  %v948_v26 = vrot.slane %v934_v19, %v2709_v24  ;;  %v899_v27 = vcombine.low %v890_v17, %v898_v23  ;;  %v900_v29 = vcombine.high %v890_v17, %v898_v23 }
 0x3e1   : > { %v2808_v30 = vpop.eup %2209  ;;  %v949_v31 = vcombine.high %v941_v25, %v2412_v35  ;;  %v907_v32 = vrot.slane %v899_v27, %v2709_v24  ;;  %v914_v33 = vrot.slane %v900_v29, %v2709_v24  ;;  %v950_v37 = vcombine.high %v948_v26, %v2412_v35 }
 0x3e2   : > { %v1281_v34 = vsel %vm1066_vm3, %v2808_v30, 0.0  ;;  %v956_v38 = vshrl.u32 %v941_v25, 16  ;;  %v972_v39 = vshrl.u32 %v948_v26, 16 }
 0x3e3   : > { %v2815_v36 = vpop.eup %2211  ;;  %1282 = vadd.xlane.f32.xlu0 %v1281_v34  ;;  %v915_v40 = vcombine.high %v907_v32, %v2412_v35  ;;  %v916_v41 = vcombine.high %v914_v33, %v2412_v35  ;;  %v953_v42 = vpack.i.b16 %v941_v25, %v907_v32  ;;  %v955_v43 = vshrl.u32 %v907_v32, 16 }
 0x3e4   : > { %v964_v44 = vshrl.u32 %v949_v31, 16  ;;  %v969_v45 = vpack.i.b16 %v948_v26, %v914_v33  ;;  %v971_v46 = vshrl.u32 %v914_v33, 16  ;;  %v1284_v47 = vsel %vm1066_vm3, %v2815_v36, 0.0 }
 0x3e5   : > { %v957_v48 = vpack.i.b16 %v956_v38, %v955_v43  ;;  %v961_v49 = vpack.i.b16 %v949_v31, %v915_v40  ;;  %v963_v50 = vshrl.u32 %v915_v40, 16  ;;  %v977_v51 = vpack.i.b16 %v950_v37, %v916_v41  ;;  %1285 = vadd.xlane.f32.xlu1 %v1284_v47 }
 0x3e6   : > { %v980_v52 = vshrl.u32 %v950_v37, 16  ;;  %v973_v53 = vpack.i.b16 %v972_v39, %v971_v46  ;;  %v979_v54 = vshrl.u32 %v916_v41, 16  ;;  %v983_v55 = vcombine.low %v953_v42, %v969_v45 }
 0x3e7   : > { %v965_v56 = vpack.i.b16 %v964_v44, %v963_v50  ;;  %v991_v57 = vcombine.low %v961_v49, %v977_v51 }
 0x3e8   : > { %v981_v58 = vpack.i.b16 %v980_v52, %v979_v54  ;;  %v1008_v59 = vcombine.low %v957_v48, %v973_v53  ;;  %v990_v60 = vrot.slane %v983_v55, %v2701_v20 }
 0x3e9   : > { %v998_v61 = vrot.slane %v991_v57, %v2701_v20 }
 0x3ea   : > { %v1016_v62 = vcombine.low %v965_v56, %v981_v58  ;;  %v1015_v1 = vrot.slane %v1008_v59, %v2701_v20 }
 0x3eb   : > { %v999_v63 = vcombine.low %v990_v60, %v998_v61 }
 0x3ec   : > { %v1023_v2 = vrot.slane %v1016_v62, %v2701_v20 }
 0x3ed   : > { %v1006_v4 = vrot.slane %v999_v63, %v2709_v24 }
 0x3ee   : > { %v1024_v5 = vcombine.low %v1015_v1, %v1023_v2 }
 0x3ef   : > { %v1007_v6 = vcombine.high %v1006_v4, %v2412_v35  ;;  %v1037_v10 = vshrl.u32 %v1006_v4, 16 }
 0x3f0   : > { %v1031_v7 = vrot.slane %v1024_v5, %v2709_v24 }
 0x3f1   : > { %v1045_v13 = vshrl.u32 %v1007_v6, 16 }
 0x3f2   : > { %v1032_v8 = vcombine.high %v1031_v7, %v2412_v35  ;;  %v1035_v22 = vpack.i.b16 %v1031_v7, %v1006_v4  ;;  %v1038_v9 = vshrl.u32 %v1031_v7, 16 }
 0x3f4   : > { %v1039_v21 = vpack.i.b16 %v1038_v9, %v1037_v10  ;;  %v1043_v11 = vpack.i.b16 %v1032_v8, %v1007_v6  ;;  %v1046_v14 = vshrl.u32 %v1032_v8, 16  ;;  %1049 = vst.msk [vmem:[#allocation4] sm:$0xf] %vm692_vm2, %v1035_v22  ;;  %v2201_v22 = vld [vmem:[#allocation10] sm:$0xff]  }
 0x3f6   : > { %v1047_v15 = vpack.i.b16 %v1046_v14, %v1045_v13  ;;  %1050 = vst.msk [vmem:[#allocation4 + $0x4] sm:$0xf] %vm692_vm2, %v1039_v21  ;;  %1051 = vst.msk [vmem:[#allocation4 + $0x8] sm:$0xf] %vm692_vm2, %v1043_v11 }
 0x3f8   : > { %1052 = vst.msk [vmem:[#allocation4 + $0xc] sm:$0xf] %vm692_vm2, %v1047_v15 }
 0x3fb   : > { %v1299_v16 = vld [vmem:[#allocation4] sm:$0xf] }
 0x3fc   : > { %v1308_v35 = vsel %vm1306_vm4, %v1299_v16, 0 }
 0x3fd   : > { %2062 = vmatpush3.bf16.msra.mxu1 %v1308_v35  ;;  %v1300_v17 = vld [vmem:[#allocation4 + $0x4] sm:$0xf]  ;;  %v1301_v32 = vld [vmem:[#allocation4 + $0x8] sm:$0xf]  ;;  %v2202_v35 = vld [vmem:[#allocation10 + $0x8] sm:$0xff]  }
 0x3fe   : > { %v1354_v18 = vsel %vm1306_vm4, %v1300_v17, 0  ;;  %2073 = vmatprep.subr.bf16.mxu1 %v2404_v0  ;;  %v1400_v38 = vsel %vm1306_vm4, %v1301_v32, 0 }
 0x3ff   : > { %2068 = vmatpush3.bf16.msra.mxu0 %v1354_v18  ;;  %v1302_v37 = vld [vmem:[#allocation4 + $0xc] sm:$0xf] }
 0x400   : > { %2079 = vmatprep.subr.bf16.mxu0 %v2404_v0 }
 0x468   : > { %v1277_v19 = vpop.xlane.xlu1 %1276 }
 0x469   : > { %2213 = vrcp.f32 %v1277_v19 }
 0x46a   : > { %v1280_v23 = vpop.xlane.xlu0 %1279 }
 0x46b   : > { %2215 = vrcp.f32 %v1280_v23 }
 0x470   : > { %v1283_v25 = vpop.xlane.xlu0 %1282 }
 0x471   : > { %2217 = vrcp.f32 %v1283_v25 }
 0x472   : > { %v1286_v27 = vpop.xlane.xlu1 %1285 }
 0x473   : > { %v2214_v26 = vpop.eup %2213  ;;  %2219 = vrcp.f32 %v1286_v27 }
 0x474   : > { %v1291_v29 = vmul.f32 %v2214_v26, %v2794_v28  ;;  %v1446_v28 = vsel %vm1306_vm4, %v1302_v37, 0 }
 0x475   : > { %v2216_v31 = vpop.eup %2215 }
 0x476   : > { %v1292_v33 = vmul.f32 %v2216_v31, %v2798_v12  ;;  %v1295_v34 = vpack.c.bf16 %v1291_v29, %v1291_v29 }
 0x478   : > { %2064 = vmatmul.mubr.msk.bf16.vlgmr.msra.gmra.mrb[8].mxu1 %vm1066_vm3, %v1295_v34  ;;  %v1296_v39 = vpack.c.bf16 %v1292_v33, %v1292_v33 }
 0x479   : > { %2074 = vmatpush3.bf16.msra.mxu1 %v1400_v38  ;;  %2075 = vmatprep.mubr.msk.bf16.mxu1 %vm2405_vm0, %v2404_v0 }
 0x47a   : > { %2070 = vmatmul.mubr.msk.bf16.vlgmr.msra.gmra.mrb[12].mxu0 %vm1066_vm3, %v1296_v39  ;;  %2085 = vmatprep.subr.bf16.mxu1 %v2404_v0 }
 0x47b   : > { %v2218_v40 = vpop.eup %2217  ;;  %2080 = vmatpush3.bf16.msra.mxu0 %v1446_v28  ;;  %2081 = vmatprep.mubr.msk.bf16.mxu0 %vm2405_vm0, %v2404_v0 }
 0x47c   : > { %v1293_v12 = vmul.f32 %v2218_v40, %v2808_v30  ;;  %2093 = vmatprep.subr.bf16.mxu0 %v2404_v0 }
 0x47d   : > { %v2220_v41 = vpop.eup %2219 }
 0x47e   : > { %v1297_v42 = vpack.c.bf16 %v1293_v12, %v1293_v12  ;;  %v1294_v43 = vmul.f32 %v2220_v41, %v2815_v36 }
 0x480   : > { %2076 = vmatmul.mubr.msk.bf16.vlgmr.msra.gmra.mrb[12].mxu1 %vm1066_vm3, %v1297_v42  ;;  %v1298_v44 = vpack.c.bf16 %v1294_v43, %v1294_v43 }
 0x481   : > { %2089 = vmatprep.mubr.msk.bf16.mxu1 %vm2405_vm0, %v2404_v0  ;;  %2086 = vmatpush3.bf16.msra.mxu1 %v2201_v22 }
 0x482   : > { %2082 = vmatmul.mubr.msk.bf16.vlgmr.msra.gmra.mrb[16].mxu0 %vm1066_vm3, %v1298_v44  ;;  %2087 = vmatprep.subr.bf16.mxu1 %v2404_v0  ;;  %v1988_v44 = vld [vmem:[%s2968_s4] ss:$0 sm:$0xff] }
 0x483   : > { %2097 = vmatprep.mubr.msk.bf16.mxu0 %vm2405_vm0, %v2404_v0 }
 0x485   : > { %2088 = vmatpush3.bf16.msra.mxu1 %v2202_v35 }
 0x54b   : > { %v1344_v45 = vpop.f32.mrb[8].mxu1 }
 0x54c   : > { %v2065_v46 = vpop.f32.mrb[9].mxu1 }
 0x54d   : > { %v1347_v30 = vpop.f32.mrb[10].mxu1  ;;  %v1390_v47 = vpop.f32.mrb[12].mxu0 }
 0x54e   : > { %v2066_v48 = vpop.f32.mrb[11].mxu1  ;;  %v2071_v49 = vpop.f32.mrb[13].mxu0 }
 0x54f   : > { %v1393_v50 = vpop.f32.mrb[14].mxu0 }
 0x550   : > { %v2072_v51 = vpop.f32.mrb[15].mxu0 }
 0x553   : > { %v1436_v36 = vpop.f32.mrb[12].mxu1 }
 0x554   : > { %v1488_v52 = vcombine.low %v1344_v45, %v1436_v36  ;;  %v1489_v53 = vcombine.high %v1344_v45, %v1436_v36  ;;  %v2077_v54 = vpop.f32.mrb[13].mxu1 }
 0x555   : > { %v1439_v55 = vpop.f32.mrb[14].mxu1  ;;  %v1482_v56 = vpop.f32.mrb[16].mxu0 }
 0x556   : > { %v2078_v57 = vpop.f32.mrb[15].mxu1  ;;  %v1504_v58 = vcombine.low %v1390_v47, %v1482_v56  ;;  %v1505_v59 = vcombine.high %v1390_v47, %v1482_v56  ;;  %v2083_v60 = vpop.f32.mrb[17].mxu0  ;;  %v1496_v62 = vrot.slane %v1488_v52, %v2701_v20  ;;  %v1503_v63 = vrot.slane %v1489_v53, %v2701_v20  ;;  %v2203_v52 = vld [vmem:[%s2971_s7] sm:$0xff]   ;;  %v2204_v53 = vld [vmem:[%s2971_s7 + $0x8] sm:$0xff]  }
 0x557   : > { %v1485_v61 = vpop.f32.mrb[18].mxu0  ;;  %2094 = vmatpush3.bf16.msra.mxu0 %v2203_v52 }
 0x558   : > { %v1512_v1 = vrot.slane %v1504_v58, %v2701_v20  ;;  %v1519_v2 = vrot.slane %v1505_v59, %v2701_v20  ;;  %v2084_v4 = vpop.f32.mrb[19].mxu0  ;;  %2095 = vmatprep.subr.bf16.mxu0 %v2404_v0  ;;  %v1993_v0 = vld [vmem:[%s2970_s6] ss:$0 sm:$0xff] }
 0x55a   : > { %v1520_v5 = vcombine.low %v1496_v62, %v1512_v1  ;;  %v1521_v6 = vcombine.high %v1496_v62, %v1512_v1  ;;  %v1536_v7 = vcombine.low %v1503_v63, %v1519_v2  ;;  %v1537_v8 = vcombine.high %v1503_v63, %v1519_v2  ;;  %v1992_v62 = vld [vmem:[%s2969_s5] ss:$0 sm:$0xff] }
 0x55b   : > { %2096 = vmatpush3.bf16.msra.mxu0 %v2204_v53 }
 0x55c   : > { %v1528_v10 = vrot.slane %v1520_v5, %v2709_v24  ;;  %v1535_v9 = vrot.slane %v1521_v6, %v2709_v24  ;;  %v1544_v21 = vrot.slane %v1536_v7, %v2709_v24  ;;  %v1551_v11 = vrot.slane %v1537_v8, %v2709_v24  ;;  %v1994_v5 = vld [vmem:[%s2972_s8] ss:$0 sm:$0xff] }
 0x55e   : > { %v1556_v13 = vcombine.low %v1528_v10, %v1535_v9  ;;  %v1986_v14 = vcombine.high %v1528_v10, %v1535_v9  ;;  %v1572_v15 = vcombine.low %v1544_v21, %v1551_v11  ;;  %v1987_v16 = vcombine.high %v1544_v21, %v1551_v11 }
 0x560   : > { %v1563_v17 = vrot.slane %v1556_v13, %v2701_v20  ;;  %v1571_v18 = vrot.slane %v1986_v14, %v2701_v20  ;;  %v1579_v19 = vrot.slane %v1572_v15, %v2701_v20  ;;  %v1587_v23 = vrot.slane %v1987_v16, %v2701_v20 }
 0x562   : > { %v1589_v25 = vcombine.high %v1563_v17, %v1571_v18  ;;  %v1605_v26 = vcombine.high %v1579_v19, %v1587_v23  ;;  %v1588_v27 = vcombine.low %v1563_v17, %v1571_v18  ;;  %v1604_v29 = vcombine.low %v1579_v19, %v1587_v23 }
 0x564   : > { %v1603_v31 = vrot.slane %v1589_v25, %v2709_v24  ;;  %v1619_v32 = vrot.slane %v1605_v26, %v2709_v24  ;;  %v1596_v33 = vrot.slane %v1588_v27, %v2709_v24  ;;  %v1612_v34 = vrot.slane %v1604_v29, %v2709_v24  ;;  %v1998_v26 = vld [vmem:[%s3002_s30] ss:$0 sm:$0xff] }
 0x565   : > { %v1999_v29 = vld [vmem:[%s3003_s29] ss:$0 sm:$0xff] }
 0x566   : > { %v1622_v37 = vcombine.low %v1603_v31, %v1619_v32  ;;  %v1621_v38 = vcombine.high %v1596_v33, %v1612_v34  ;;  %v1623_v39 = vcombine.high %v1603_v31, %v1619_v32  ;;  %v1620_v28 = vcombine.low %v1596_v33, %v1612_v34 }
 0x568   : > { %1629 = vrot.lane.b32.xlu1 %v1622_v37, %s2414_s23  ;;  %1625 = vrot.lane.b32.xlu0 %v1621_v38, %s2415_s26  ;;  %s3004_s26 = sld [smem:[#allocation21_spill]] }
 0x56c   : > { %1633 = vrot.lane.b32.xlu1 %v1623_v39, %s2416_s16  ;;  %s3001_s16 = sld [smem:[#allocation16_spill]] }
 0x572   : > { %s2001_s14 = sshll.u32 %s3001_s16, 7  ;;  %s2315_s16 = sshll.u32 %s2417_s11, 4  ;;  %s2316_s16 = int_to_ptr.vmem [resolvable:$false] %s2315_s16 }
 0x573   : > { %s2914_s0 = scalar_lea.hbm %s3004_s26, %s2001_s14  ;;  %s2317_s30 = scalar_lea.vmem %s2316_s16, 256 }
 0x574   : > { %p2318_p3 = scmp.lt.s32.totalorder %s2916_s9, %s2316_s16  ;;  %p2319_p5 = scmp.lt.s32.totalorder %s2317_s30, %s2311_s24 }
 0x576   : > { %p2320_p9 = por %p2319_p5, %p2318_p3 }
 0x578   : > { %p2321_p11 = pnand %p2320_p9, %p2314_p10 }
 0x5da   : > { %v1630_v20 = vpop.permute.xlu1 %1629  ;;  %v1626_v40 = vpop.permute.xlu0 %1625 }
 0x5db   : > { %v1636_v12 = vsel %vm1066_vm3, %v1620_v28, %v1626_v40 }
 0x5dc   : > { %v1638_v42 = vsel %vm1637_vm5, %v1636_v12, %v1630_v20 }
 0x5de   : > { %v1634_v41 = vpop.permute.xlu1 %1633 }
 0x5df   : > { %v1640_v43 = vsel %vm1639_vm6, %v1638_v42, %v1634_v41 }
 0x5e0   : > { %v1641_v24 = vpack.c.bf16 %v1640_v43, %v1640_v43 }
 0x5e2   : > { %2090 = vmatmul.mubr.msk.bf16.vlgmr.msra.gmra.mrb[16].mxu1 %vm475_vm1, %v1641_v24 }
 0x6b5   : > { %v1703_v45 = vpop.f32.mrb[16].mxu1 }
 0x6b6   : > { %v1704_v46 = vadd.f32 %v1988_v44, %v1703_v45  ;;  %v2091_v30 = vpop.f32.mrb[17].mxu1 }
 0x6b7   : > { %v1706_v47 = vpop.f32.mrb[18].mxu1 }
 0x6b8   : > { %v1711_v48 = vadd.f32 %v1704_v46, %v2683_v3  ;;  %v2092_v49 = vpop.f32.mrb[19].mxu1 }
 0x6ba   : > { %v1714_v50 = vsel %vm475_vm1, %v1711_v48, 0.0  ;;  %v1719_v51 = vmul.f32 %v1711_v48, %v1711_v48 }
 0x6bb   : > { %1715 = vadd.xlane.f32.xlu0 %v1714_v50 }
 0x6bc   : > { %v1720_v36 = vsel %vm475_vm1, %v1719_v51, 0.0 }
 0x6bd   : > { %1721 = vadd.xlane.f32.xlu1 %v1720_v36 }
 0x748   : > { %v1716_v3 = vpop.xlane.xlu0 %1715 }
 0x749   : > { %v1718_v54 = vmul.f32 0.03125, %v1716_v3 }
 0x74a   : > { %v1722_v55 = vpop.xlane.xlu1 %1721 }
 0x74b   : > { %v1724_v56 = vmul.f32 %v1718_v54, %v1718_v54  ;;  %v1723_v57 = vmul.f32 0.03125, %v1722_v55  ;;  %v1726_v60 = vsub.f32 %v1711_v48, %v1718_v54 }
 0x74d   : > { %v1725_v58 = vsub.f32 %v1723_v57, %v1724_v56 }
 0x74f   : > { %v1727_v59 = vadd.f32 1e-05, %v1725_v58 }
 0x751   : > { %2221 = vrsqrt.f32 %v1727_v59 }
 0x75b   : > { %v2222_v61 = vpop.eup %2221 }
 0x75c   : > { %v1729_v63 = vmul.f32 %v2222_v61, %v1726_v60 }
 0x75e   : > { %v1736_v1 = vmul.f32 %v1992_v62, %v1729_v63 }
 0x760   : > { %v1743_v2 = vadd.f32 %v1993_v0, %v1736_v1 }
 0x762   : > { %v1744_v4 = vpack.c.bf16 %v1743_v2, %v1743_v2 }
 0x764   : > { %2098 = vmatmul.mubr.msk.bf16.vlgmr.msra.gmra.mrb[20].mxu0 %vm475_vm1, %v1744_v4 }
 0x837   : > { %v1805_v6 = vpop.f32.mrb[20].mxu0 }
 0x838   : > { %v1806_v7 = vadd.f32 %v1994_v5, %v1805_v6  ;;  %v2099_v8 = vpop.f32.mrb[21].mxu0 }
 0x839   : > { %v1808_v22 = vpop.f32.mrb[22].mxu0 }
 0x83a   : > { %v1811_v10 = vadd.f32 %v1806_v7, %v1743_v2  ;;  %v2100_v9 = vpop.f32.mrb[23].mxu0 }
 0x83c   : > { %v1814_v21 = vsel %vm475_vm1, %v1811_v10, 0.0  ;;  %v1818_v11 = vmul.f32 %v1811_v10, %v1811_v10 }
 0x83d   : > { %1815 = vadd.xlane.f32.xlu0 %v1814_v21 }
 0x83e   : > { %v1819_v13 = vsel %vm475_vm1, %v1818_v11, 0.0 }
 0x841   : > { %1820 = vadd.xlane.f32.xlu0 %v1819_v13 }
 0x8ca   : > { %v1816_v14 = vpop.xlane.xlu0 %1815 }
 0x8cb   : > { %v1817_v15 = vmul.f32 0.03125, %v1816_v14 }
 0x8cd   : > { %v1823_v35 = vmul.f32 %v1817_v15, %v1817_v15  ;;  %v1825_v23 = vsub.f32 %v1811_v10, %v1817_v15 }
 0x8ce   : > { %v1821_v16 = vpop.xlane.xlu0 %1820 }
 0x8cf   : > { %v1822_v17 = vmul.f32 0.03125, %v1821_v16 }
 0x8d1   : > { %v1824_v18 = vsub.f32 %v1822_v17, %v1823_v35 }
 0x8d3   : > { %v1826_v19 = vadd.f32 1e-05, %v1824_v18 }
 0x8d5   : > { %2223 = vrsqrt.f32 %v1826_v19 }
 0x8df   : > { %v2224_v25 = vpop.eup %2223 }
 0x8e0   : > { %v1828_v27 = vmul.f32 %v2224_v25, %v1825_v23 }
 0x8e2   : > { %v1835_v31 = vmul.f32 %v1998_v26, %v1828_v27 }
 0x8e4   : > { %v1842_v32 = vadd.f32 %v1999_v29, %v1835_v31 }
 0x8e6   : > { %1843 = vst.msk [vmem:[%s444_s12] sm:$0xff] %vm475_vm1, %v1842_v32 }
 0x8e7   : > { %2324 = shalt.err (!%p2321_p11)
}
 0x8e8   : > { %s2325_s28 = scalar_lea.hbm %s2914_s0, 128  ;;  %s2329_s29 = scalar_lea.hbm %s3004_s26, 256 }
 0x8e9   : > { %p2326_p0 = scmp.ne.s32.totalorder %s2914_s0, %s2325_s28  ;;  %p2330_p6 = scmp.lt.u32.totalorder %s2914_s0, %s3004_s26 }
 0x8ea   : > { %p2331_p7 = scmp.lt.u32.totalorder %s2329_s29, %s2325_s28  ;;  %p2333_p8 = scmp.lt.u32.totalorder %s2325_s28, %s2914_s0 }
 0x8eb   : > { %p2327_p4 = pnand %p2326_p0, %p3005_p12 }
 0x8ec   : > { %p2332_p2 = por %p2331_p7, %p2330_p6 }
 0x8ed   : > { %p2328_p13 = pneg %p2327_p4 }
 0x8ee   : > { %p2334_p1 = por %p2333_p8, %p2332_p2 }
 0x8f0   : > { %p2335_p10 = pnand %p2334_p1, %p2328_p13 }
 0x8f2   : > { %2338 = shalt.err (!%p2335_p10)
}
 0x8f3   : > { %2111 = dma.vmem_to_hbm [thread:$0]  (%p3005_p12), %s2916_s9, 128, %s2914_s0, %s1845_s15  }
 0x8f4 PF: > { %s3006_s10 = sld [smem:[#allocation15_spill]]  ;;  %s3007_s23 = sld [smem:[#allocation17_spill]] }
 0x8f5   : > { %p3009_p5 = scmp.ge.s32.totalorder %s2397_s22, 2 }
 0x8fa   : > { %s1871_s24 = sand.u32 1, %s3006_s10   ;;  %p3008_p3 = scmp.ne.s32.totalorder %s3007_s23, 0 }
 0x8fb   : > { %s1872_s11 = scalar_lea.sflag [#allocation7], %s1871_s24 }
 0x8fc   : > { %p2125_p9 = pnand %p3009_p5, %p3008_p3 }
 0x8fe   : > { %2372 = dma.done.wait (!%p2125_p9), %s1872_s11, 128  }
 0x8ff   : > { %2374 = vsyncadd (!%p2125_p9), %s1872_s11, 4294967168  ;;  %s28_s22 = sadd.s32 1, %s2397_s22   ;;  %s3010_s13 = smov %s2620_s17 }
 0x900   : > { %p25_p11 = scmp.ge.s32.totalorder %s28_s22, 4   ;;  %s3011_s16 = smov %s3018_s20 }
 0x901   : > { %s3012_s17 = smov %s2381_s18  ;;  %s3013_s18 = smov %s2385_s19 }
 0x902   : > { %s3014_s19 = smov %s3010_s13  ;;  %s3015_s20 = smov %s2393_s21 }
 0x903   : > { %s3016_s21 = smov %s3011_s16  ;;  %27 = sbr.rel (!%p25_p11) target bundleno = 12 (0xc), region = 123 }
 0x90a   :  { %1877 = vsyncpa [#allocation6], 1 }
 0x90b   :  { %1879 = vsyncpa [#allocation6 + $0x1], 1 }
 0x90c   :  { %1880 = vsyncpa [#allocation9], 1 }
 0x90d   :  { %1881 = vsyncpa [#allocation7], 1 }
 0x90e   :  { %1883 = vsyncpa [#allocation7 + $0x1], 1 }

</bundles_post_ra>
